<compile_context>
chip_gen: v7x
topology: tpu7x:2x2x1
jax: 0.10.0
libtpu: 0.0.40
codegen_flags: <defaults>
</compile_context>

<pallas_src>
import functools
import math

import jax
import jax.numpy as jnp
from jax import lax
from jax.experimental import pallas as pl
from jax.experimental.pallas import tpu as pltpu

# ------------------------- model hyperparameters -------------------------
VOCAB_SIZE = 64
MAX_SEQ_LEN = 16
D_MODEL = 32
D_FF = 64
NUM_HEADS = 4
NUM_LAYERS = 2
HEAD_DIM = D_MODEL // NUM_HEADS
LN_EPS = 1e-5          # torch nn.LayerNorm default
PAD_V = 128            # lane-dense classifier output width (>= VOCAB_SIZE)


# ------------------------------ kernel ------------------------------------
def _layer_norm(x, gamma, beta):
    # torch LayerNorm: biased variance, eps inside sqrt.
    mean = jnp.mean(x, axis=-1, keepdims=True)
    var = jnp.mean((x - mean) ** 2, axis=-1, keepdims=True)
    inv = lax.rsqrt(var + LN_EPS)
    return (x - mean) * inv * gamma + beta


def gpt_forward_kernel(
    x_ref, attn_ref,
    wqkv_ref, bqkv_ref, wo_ref, bo_ref,
    w1_ref, b1_ref, w2_ref, b2_ref,
    g1_ref, be1_ref, g2_ref, be2_ref,
    wcls_ref, bcls_ref,
    out_ref,
    ctx_scr,
    *, batch, seq,
):
    """Whole GPT forward for a (batch*seq, D) activation block in one program."""
    x = x_ref[...]                                   # (B*S, D) f32
    scale = 1.0 / math.sqrt(float(HEAD_DIM))

    # Causal mask built in-kernel (shared across batches / layers).
    row = lax.broadcasted_iota(jnp.int32, (seq, seq), 0)
    col = lax.broadcasted_iota(jnp.int32, (seq, seq), 1)
    causal = row >= col                              # (S, S) bool

    for layer in range(NUM_LAYERS):                  # static python loop, traced inline
        # ---- fused QKV projection: one MXU push, lane width 3*D=96 ----
        qkv = jnp.dot(x, wqkv_ref[layer],
                      preferred_element_type=jnp.float32) + bqkv_ref[layer]
        q = qkv[:, 0:D_MODEL]
        k = qkv[:, D_MODEL:2 * D_MODEL]
        v = qkv[:, 2 * D_MODEL:3 * D_MODEL]

        # ---- multi-head attention, per (batch, head); ctx -> VMEM scratch ----
        # TODO(synk): create_mask source not provided; assuming causal AND key-padding.
        for b in range(batch):
            rs = b * seq
            keep = attn_ref[b:b + 1, :] > 0.5                  # (1, S) key keep
            mask_b = jnp.where(causal & keep, 0.0, -1e9)       # (S, S) additive mask
            for h in range(NUM_HEADS):
                lo = h * HEAD_DIM
                qh = q[rs:rs + seq, lo:lo + HEAD_DIM]
                kh = k[rs:rs + seq, lo:lo + HEAD_DIM]
                vh = v[rs:rs + seq, lo:lo + HEAD_DIM]
                # contract head dims directly (qh @ kh.T without explicit transpose)
                s = lax.dot_general(qh, kh, (((1,), (1,)), ((), ())),
                                    preferred_element_type=jnp.float32) * scale
                s = s + mask_b
                s = s - jnp.max(s, axis=-1, keepdims=True)
                p = jnp.exp(s)
                inv = pl.reciprocal(jnp.sum(p, axis=-1, keepdims=True), approx=True)
                p = p * inv
                ctx_scr[rs:rs + seq, lo:lo + HEAD_DIM] = jnp.dot(
                    p, vh, preferred_element_type=jnp.float32)

        ctx = ctx_scr[...]                                      # (B*S, D)
        m = jnp.dot(ctx, wo_ref[layer],
                    preferred_element_type=jnp.float32) + bo_ref[layer]

        # residual + LayerNorm 1 (dropout is identity in eval)
        x1 = _layer_norm(x + m, g1_ref[layer], be1_ref[layer])

        # position-wise feed-forward: Linear -> ReLU -> Linear
        h1 = jnp.dot(x1, w1_ref[layer],
                     preferred_element_type=jnp.float32) + b1_ref[layer]
        h1 = jnp.maximum(h1, 0.0)
        ff = jnp.dot(h1, w2_ref[layer],
                     preferred_element_type=jnp.float32) + b2_ref[layer]

        # residual + LayerNorm 2
        x = _layer_norm(x1 + ff, g2_ref[layer], be2_ref[layer])

    # ---- tied classifier (lane-dense 128-wide output, zero-padded cols) ----
    out_ref[...] = jnp.dot(x, wcls_ref[...],
                           preferred_element_type=jnp.float32) + bcls_ref[...]


# ------------------------------ wrappers ----------------------------------
def init_params(key):
    """Deterministic init; weights stored (in_features, out_features), layers stacked."""
    def nrm(k, shape, scale=0.02):
        return (scale * jax.random.normal(k, shape)).astype(jnp.float32)

    keys = jax.random.split(key, 2 + NUM_LAYERS)
    params = {
        "embedding": nrm(keys[0], (VOCAB_SIZE, D_MODEL)),
        "pos_embedding": nrm(keys[1], (MAX_SEQ_LEN, D_MODEL)),
        "cls_bias": jnp.zeros((VOCAB_SIZE,), jnp.float32),
    }
    wqkv, bqkv, wo, bo, w1, b1, w2, b2 = [], [], [], [], [], [], [], []
    g1, be1, g2, be2 = [], [], [], []
    for li in range(NUM_LAYERS):
        lk = jax.random.split(keys[2 + li], 6)
        wq = nrm(lk[0], (D_MODEL, D_MODEL))
        wk = nrm(lk[1], (D_MODEL, D_MODEL))
        wv = nrm(lk[2], (D_MODEL, D_MODEL))
        wqkv.append(jnp.concatenate([wq, wk, wv], axis=1))        # (D, 3D) fused QKV
        bqkv.append(jnp.zeros((1, 3 * D_MODEL), jnp.float32))
        wo.append(nrm(lk[3], (D_MODEL, D_MODEL)))
        bo.append(jnp.zeros((1, D_MODEL), jnp.float32))
        w1.append(nrm(lk[4], (D_MODEL, D_FF)))
        b1.append(jnp.zeros((1, D_FF), jnp.float32))
        w2.append(nrm(lk[5], (D_FF, D_MODEL)))
        b2.append(jnp.zeros((1, D_MODEL), jnp.float32))
        g1.append(jnp.ones((1, D_MODEL), jnp.float32))
        be1.append(jnp.zeros((1, D_MODEL), jnp.float32))
        g2.append(jnp.ones((1, D_MODEL), jnp.float32))
        be2.append(jnp.zeros((1, D_MODEL), jnp.float32))

    params.update(
        wqkv=jnp.stack(wqkv), bqkv=jnp.stack(bqkv),
        wo=jnp.stack(wo), bo=jnp.stack(bo),
        w1=jnp.stack(w1), b1=jnp.stack(b1),
        w2=jnp.stack(w2), b2=jnp.stack(b2),
        g1=jnp.stack(g1), be1=jnp.stack(be1),
        g2=jnp.stack(g2), be2=jnp.stack(be2),
    )
    return params


def gpt_forward(params, tokens, attention):
    """Forward matching GPT.forward with use_kv=False, past=None.

    tokens:    int32 [B, S]
    attention: int32 [B, S] (1 = real token, 0 = padding)
    returns:   float32 logits [B, S, VOCAB_SIZE]
    """
    B, S = tokens.shape

    # token + positional embedding (gathers are plain-JAX glue), flatten to (B*S, D)
    pos = jnp.arange(S)
    x = params["embedding"][tokens] + params["pos_embedding"][pos][None, :, :]
    x = x.reshape(B * S, D_MODEL).astype(jnp.float32)
    attn_f = attention.astype(jnp.float32)

    # classifier tied to embedding: logits = x @ E^T + bias; pad lane-dense to 128
    emb_t = params["embedding"].T                                     # (D, V)
    wcls = jnp.zeros((D_MODEL, PAD_V), jnp.float32).at[:, :VOCAB_SIZE].set(emb_t)
    bcls = jnp.zeros((1, PAD_V), jnp.float32).at[:, :VOCAB_SIZE].set(
        params["cls_bias"][None, :])

    kernel = functools.partial(gpt_forward_kernel, batch=B, seq=S)
    logits_pad = pl.pallas_call(
        kernel,
        out_shape=jax.ShapeDtypeStruct((B * S, PAD_V), jnp.float32),
        scratch_shapes=[pltpu.VMEM((B * S, D_MODEL), jnp.float32)],   # attention context
    )(
        x, attn_f,
        params["wqkv"], params["bqkv"], params["wo"], params["bo"],
        params["w1"], params["b1"], params["w2"], params["b2"],
        params["g1"], params["be1"], params["g2"], params["be2"],
        wcls, bcls,
    )
    return logits_pad[:, :VOCAB_SIZE].reshape(B, S, VOCAB_SIZE)


# --------------------------------- main -----------------------------------
if __name__ == "__main__":
    B, S = 2, 8
    key = jax.random.PRNGKey(0)
    pkey, tkey = jax.random.split(key)

    params = init_params(pkey)
    tokens = jax.random.randint(tkey, (B, S), 0, VOCAB_SIZE, dtype=jnp.int32)
    # attention: batch 0 fully valid, batch 1 has last two positions padded.
    attention = jnp.array(
        [[1, 1, 1, 1, 1, 1, 1, 1],
         [1, 1, 1, 1, 1, 1, 0, 0]], dtype=jnp.int32)

    logits = gpt_forward(params, tokens, attention)
    jax.block_until_ready(logits)
    assert logits.shape == (B, S, VOCAB_SIZE)
    assert bool(jnp.all(jnp.isfinite(logits)))
    print("KERNEL_OK")
</pallas_src>

<mosaic_0001>
module attributes {stable_mosaic.version = 11 : i64} {
  func.func @gpt_forward_kernel(%arg0: memref<16x32xf32, #tpu.memory_space<vmem>>, %arg1: memref<2x8xf32, #tpu.memory_space<vmem>>, %arg2: memref<2x32x96xf32, #tpu.memory_space<vmem>>, %arg3: memref<2x1x96xf32, #tpu.memory_space<vmem>>, %arg4: memref<2x32x32xf32, #tpu.memory_space<vmem>>, %arg5: memref<2x1x32xf32, #tpu.memory_space<vmem>>, %arg6: memref<2x32x64xf32, #tpu.memory_space<vmem>>, %arg7: memref<2x1x64xf32, #tpu.memory_space<vmem>>, %arg8: memref<2x64x32xf32, #tpu.memory_space<vmem>>, %arg9: memref<2x1x32xf32, #tpu.memory_space<vmem>>, %arg10: memref<2x1x32xf32, #tpu.memory_space<vmem>>, %arg11: memref<2x1x32xf32, #tpu.memory_space<vmem>>, %arg12: memref<2x1x32xf32, #tpu.memory_space<vmem>>, %arg13: memref<2x1x32xf32, #tpu.memory_space<vmem>>, %arg14: memref<32x128xf32, #tpu.memory_space<vmem>>, %arg15: memref<1x128xf32, #tpu.memory_space<vmem>>, %arg16: memref<16x128xf32, #tpu.memory_space<vmem>>, %arg17: memref<16x32xf32, #tpu.memory_space<vmem>>) attributes {dimension_semantics = [], scalar_prefetch = 0 : i64, scratch_operands = 1 : i64, tpu.core_type = #tpu.core_type<tc>} {
    %c0 = arith.constant 0 : index
    %c0_0 = arith.constant 0 : index
    %0 = vector.load %arg0[%c0, %c0_0] : memref<16x32xf32, #tpu.memory_space<vmem>>, vector<16x32xf32>
    %1 = tpu.iota {dimensions = array<i32: 0>} : vector<8x8xi32>
    %2 = tpu.iota {dimensions = array<i32: 1>} : vector<8x8xi32>
    %3 = arith.cmpi sge, %1, %2 : vector<8x8xi32>
    %c0_1 = arith.constant 0 : index
    %c0_2 = arith.constant 0 : index
    %c0_3 = arith.constant 0 : index
    %4 = vector.load %arg2[%c0_1, %c0_2, %c0_3] : memref<2x32x96xf32, #tpu.memory_space<vmem>>, vector<1x32x96xf32>
    %5 = vector.shape_cast %4 : vector<1x32x96xf32> to vector<32x96xf32>
    %cst = arith.constant dense<0.000000e+00> : vector<16x96xf32>
    %6 = tpu.matmul %0, %5, %cst {dimension_numbers = #tpu.dot_dimension_numbers<[1], [0], [0], [1], [0, 0, 1, 1], [], []>} : vector<16x32xf32>, vector<32x96xf32>, vector<16x96xf32> -> vector<16x96xf32>
    %c0_4 = arith.constant 0 : index
    %c0_5 = arith.constant 0 : index
    %c0_6 = arith.constant 0 : index
    %7 = vector.load %arg3[%c0_4, %c0_5, %c0_6] : memref<2x1x96xf32, #tpu.memory_space<vmem>>, vector<1x1x96xf32>
    %8 = vector.shape_cast %7 : vector<1x1x96xf32> to vector<1x96xf32>
    %9 = vector.broadcast %8 : vector<1x96xf32> to vector<16x96xf32>
    %10 = arith.addf %6, %9 : vector<16x96xf32>
    %11 = vector.extract_strided_slice %10 {offsets = [0, 0], sizes = [16, 32], strides = [1, 1]} : vector<16x96xf32> to vector<16x32xf32>
    %12 = vector.extract_strided_slice %10 {offsets = [0, 32], sizes = [16, 32], strides = [1, 1]} : vector<16x96xf32> to vector<16x32xf32>
    %13 = vector.extract_strided_slice %10 {offsets = [0, 64], sizes = [16, 32], strides = [1, 1]} : vector<16x96xf32> to vector<16x32xf32>
    %c0_7 = arith.constant 0 : index
    %c0_8 = arith.constant 0 : index
    %14 = vector.load %arg1[%c0_7, %c0_8] : memref<2x8xf32, #tpu.memory_space<vmem>>, vector<1x8xf32>
    %cst_9 = arith.constant 5.000000e-01 : f32
    %15 = vector.broadcast %cst_9 : f32 to vector<1x8xf32>
    %16 = arith.cmpf ogt, %14, %15 : vector<1x8xf32>
    %17 = vector.broadcast %16 : vector<1x8xi1> to vector<8x8xi1>
    %18 = arith.andi %3, %17 : vector<8x8xi1>
    %cst_10 = arith.constant 0.000000e+00 : f32
    %cst_11 = arith.constant -1.000000e+09 : f32
    %19 = vector.broadcast %cst_10 : f32 to vector<8x8xf32>
    %20 = vector.broadcast %cst_11 : f32 to vector<8x8xf32>
    %21 = arith.select %18, %19, %20 : vector<8x8xi1>, vector<8x8xf32>
    %22 = vector.extract_strided_slice %11 {offsets = [0, 0], sizes = [8, 8], strides = [1, 1]} : vector<16x32xf32> to vector<8x8xf32>
    %23 = vector.extract_strided_slice %12 {offsets = [0, 0], sizes = [8, 8], strides = [1, 1]} : vector<16x32xf32> to vector<8x8xf32>
    %24 = vector.extract_strided_slice %13 {offsets = [0, 0], sizes = [8, 8], strides = [1, 1]} : vector<16x32xf32> to vector<8x8xf32>
    %cst_12 = arith.constant dense<0.000000e+00> : vector<8x8xf32>
    %25 = tpu.matmul %22, %23, %cst_12 {dimension_numbers = #tpu.dot_dimension_numbers<[1], [1], [0], [0], [0, 0, 1, 0], [], []>} : vector<8x8xf32>, vector<8x8xf32>, vector<8x8xf32> -> vector<8x8xf32>
    %cst_13 = arith.constant 0.353553385 : f32
    %26 = vector.broadcast %cst_13 : f32 to vector<8x8xf32>
    %27 = arith.mulf %25, %26 : vector<8x8xf32>
    %28 = arith.addf %27, %21 : vector<8x8xf32>
    %cst_14 = arith.constant dense<0xFF800000> : vector<8xf32>
    %29 = vector.multi_reduction <maximumf>, %28, %cst_14 [1] : vector<8x8xf32> to vector<8xf32>
    %30 = vector.shape_cast %29 : vector<8xf32> to vector<8x1xf32>
    %31 = vector.broadcast %30 : vector<8x1xf32> to vector<8x8xf32>
    %32 = arith.subf %28, %31 : vector<8x8xf32>
    %33 = math.exp %32 : vector<8x8xf32>
    %cst_15 = arith.constant dense<0.000000e+00> : vector<8xf32>
    %34 = vector.multi_reduction <add>, %33, %cst_15 [1] : vector<8x8xf32> to vector<8xf32>
    %35 = vector.shape_cast %34 : vector<8xf32> to vector<8x1xf32>
    %36 = tpu.reciprocal %35 {approx = true} : vector<8x1xf32> -> vector<8x1xf32>
    %37 = vector.broadcast %36 : vector<8x1xf32> to vector<8x8xf32>
    %38 = arith.mulf %33, %37 : vector<8x8xf32>
    %cst_16 = arith.constant dense<0.000000e+00> : vector<8x8xf32>
    %39 = tpu.matmul %38, %24, %cst_16 {dimension_numbers = #tpu.dot_dimension_numbers<[1], [0], [0], [1], [0, 0, 1, 1], [], []>} : vector<8x8xf32>, vector<8x8xf32>, vector<8x8xf32> -> vector<8x8xf32>
    %c0_17 = arith.constant 0 : index
    %c0_18 = arith.constant 0 : index
    %40 = vector.load %arg17[%c0_17, %c0_18] : memref<16x32xf32, #tpu.memory_space<vmem>>, vector<8x8xf32>
    tpu.vector_store %arg17[%c0_17, %c0_18], %39 {strides = array<i32>} : memref<16x32xf32, #tpu.memory_space<vmem>>, vector<8x8xf32>,
    %41 = vector.extract_strided_slice %11 {offsets = [0, 8], sizes = [8, 8], strides = [1, 1]} : vector<16x32xf32> to vector<8x8xf32>
    %42 = vector.extract_strided_slice %12 {offsets = [0, 8], sizes = [8, 8], strides = [1, 1]} : vector<16x32xf32> to vector<8x8xf32>
    %43 = vector.extract_strided_slice %13 {offsets = [0, 8], sizes = [8, 8], strides = [1, 1]} : vector<16x32xf32> to vector<8x8xf32>
    %cst_19 = arith.constant dense<0.000000e+00> : vector<8x8xf32>
    %44 = tpu.matmul %41, %42, %cst_19 {dimension_numbers = #tpu.dot_dimension_numbers<[1], [1], [0], [0], [0, 0, 1, 0], [], []>} : vector<8x8xf32>, vector<8x8xf32>, vector<8x8xf32> -> vector<8x8xf32>
    %cst_20 = arith.constant 0.353553385 : f32
    %45 = vector.broadcast %cst_20 : f32 to vector<8x8xf32>
    %46 = arith.mulf %44, %45 : vector<8x8xf32>
    %47 = arith.addf %46, %21 : vector<8x8xf32>
    %cst_21 = arith.constant dense<0xFF800000> : vector<8xf32>
    %48 = vector.multi_reduction <maximumf>, %47, %cst_21 [1] : vector<8x8xf32> to vector<8xf32>
    %49 = vector.shape_cast %48 : vector<8xf32> to vector<8x1xf32>
    %50 = vector.broadcast %49 : vector<8x1xf32> to vector<8x8xf32>
    %51 = arith.subf %47, %50 : vector<8x8xf32>
    %52 = math.exp %51 : vector<8x8xf32>
    %cst_22 = arith.constant dense<0.000000e+00> : vector<8xf32>
    %53 = vector.multi_reduction <add>, %52, %cst_22 [1] : vector<8x8xf32> to vector<8xf32>
    %54 = vector.shape_cast %53 : vector<8xf32> to vector<8x1xf32>
    %55 = tpu.reciprocal %54 {approx = true} : vector<8x1xf32> -> vector<8x1xf32>
    %56 = vector.broadcast %55 : vector<8x1xf32> to vector<8x8xf32>
    %57 = arith.mulf %52, %56 : vector<8x8xf32>
    %cst_23 = arith.constant dense<0.000000e+00> : vector<8x8xf32>
    %58 = tpu.matmul %57, %43, %cst_23 {dimension_numbers = #tpu.dot_dimension_numbers<[1], [0], [0], [1], [0, 0, 1, 1], [], []>} : vector<8x8xf32>, vector<8x8xf32>, vector<8x8xf32> -> vector<8x8xf32>
    %c0_24 = arith.constant 0 : index
    %c8 = arith.constant 8 : index
    %59 = vector.load %arg17[%c0_24, %c8] : memref<16x32xf32, #tpu.memory_space<vmem>>, vector<8x8xf32>
    tpu.vector_store %arg17[%c0_24, %c8], %58 {strides = array<i32>} : memref<16x32xf32, #tpu.memory_space<vmem>>, vector<8x8xf32>,
    %60 = vector.extract_strided_slice %11 {offsets = [0, 16], sizes = [8, 8], strides = [1, 1]} : vector<16x32xf32> to vector<8x8xf32>
    %61 = vector.extract_strided_slice %12 {offsets = [0, 16], sizes = [8, 8], strides = [1, 1]} : vector<16x32xf32> to vector<8x8xf32>
    %62 = vector.extract_strided_slice %13 {offsets = [0, 16], sizes = [8, 8], strides = [1, 1]} : vector<16x32xf32> to vector<8x8xf32>
    %cst_25 = arith.constant dense<0.000000e+00> : vector<8x8xf32>
    %63 = tpu.matmul %60, %61, %cst_25 {dimension_numbers = #tpu.dot_dimension_numbers<[1], [1], [0], [0], [0, 0, 1, 0], [], []>} : vector<8x8xf32>, vector<8x8xf32>, vector<8x8xf32> -> vector<8x8xf32>
    %cst_26 = arith.constant 0.353553385 : f32
    %64 = vector.broadcast %cst_26 : f32 to vector<8x8xf32>
    %65 = arith.mulf %63, %64 : vector<8x8xf32>
    %66 = arith.addf %65, %21 : vector<8x8xf32>
    %cst_27 = arith.constant dense<0xFF800000> : vector<8xf32>
    %67 = vector.multi_reduction <maximumf>, %66, %cst_27 [1] : vector<8x8xf32> to vector<8xf32>
    %68 = vector.shape_cast %67 : vector<8xf32> to vector<8x1xf32>
    %69 = vector.broadcast %68 : vector<8x1xf32> to vector<8x8xf32>
    %70 = arith.subf %66, %69 : vector<8x8xf32>
    %71 = math.exp %70 : vector<8x8xf32>
    %cst_28 = arith.constant dense<0.000000e+00> : vector<8xf32>
    %72 = vector.multi_reduction <add>, %71, %cst_28 [1] : vector<8x8xf32> to vector<8xf32>
    %73 = vector.shape_cast %72 : vector<8xf32> to vector<8x1xf32>
    %74 = tpu.reciprocal %73 {approx = true} : vector<8x1xf32> -> vector<8x1xf32>
    %75 = vector.broadcast %74 : vector<8x1xf32> to vector<8x8xf32>
    %76 = arith.mulf %71, %75 : vector<8x8xf32>
    %cst_29 = arith.constant dense<0.000000e+00> : vector<8x8xf32>
    %77 = tpu.matmul %76, %62, %cst_29 {dimension_numbers = #tpu.dot_dimension_numbers<[1], [0], [0], [1], [0, 0, 1, 1], [], []>} : vector<8x8xf32>, vector<8x8xf32>, vector<8x8xf32> -> vector<8x8xf32>
    %c0_30 = arith.constant 0 : index
    %c16 = arith.constant 16 : index
    %78 = vector.load %arg17[%c0_30, %c16] : memref<16x32xf32, #tpu.memory_space<vmem>>, vector<8x8xf32>
    tpu.vector_store %arg17[%c0_30, %c16], %77 {strides = array<i32>} : memref<16x32xf32, #tpu.memory_space<vmem>>, vector<8x8xf32>,
    %79 = vector.extract_strided_slice %11 {offsets = [0, 24], sizes = [8, 8], strides = [1, 1]} : vector<16x32xf32> to vector<8x8xf32>
    %80 = vector.extract_strided_slice %12 {offsets = [0, 24], sizes = [8, 8], strides = [1, 1]} : vector<16x32xf32> to vector<8x8xf32>
    %81 = vector.extract_strided_slice %13 {offsets = [0, 24], sizes = [8, 8], strides = [1, 1]} : vector<16x32xf32> to vector<8x8xf32>
    %cst_31 = arith.constant dense<0.000000e+00> : vector<8x8xf32>
    %82 = tpu.matmul %79, %80, %cst_31 {dimension_numbers = #tpu.dot_dimension_numbers<[1], [1], [0], [0], [0, 0, 1, 0], [], []>} : vector<8x8xf32>, vector<8x8xf32>, vector<8x8xf32> -> vector<8x8xf32>
    %cst_32 = arith.constant 0.353553385 : f32
    %83 = vector.broadcast %cst_32 : f32 to vector<8x8xf32>
    %84 = arith.mulf %82, %83 : vector<8x8xf32>
    %85 = arith.addf %84, %21 : vector<8x8xf32>
    %cst_33 = arith.constant dense<0xFF800000> : vector<8xf32>
    %86 = vector.multi_reduction <maximumf>, %85, %cst_33 [1] : vector<8x8xf32> to vector<8xf32>
    %87 = vector.shape_cast %86 : vector<8xf32> to vector<8x1xf32>
    %88 = vector.broadcast %87 : vector<8x1xf32> to vector<8x8xf32>
    %89 = arith.subf %85, %88 : vector<8x8xf32>
    %90 = math.exp %89 : vector<8x8xf32>
    %cst_34 = arith.constant dense<0.000000e+00> : vector<8xf32>
    %91 = vector.multi_reduction <add>, %90, %cst_34 [1] : vector<8x8xf32> to vector<8xf32>
    %92 = vector.shape_cast %91 : vector<8xf32> to vector<8x1xf32>
    %93 = tpu.reciprocal %92 {approx = true} : vector<8x1xf32> -> vector<8x1xf32>
    %94 = vector.broadcast %93 : vector<8x1xf32> to vector<8x8xf32>
    %95 = arith.mulf %90, %94 : vector<8x8xf32>
    %cst_35 = arith.constant dense<0.000000e+00> : vector<8x8xf32>
    %96 = tpu.matmul %95, %81, %cst_35 {dimension_numbers = #tpu.dot_dimension_numbers<[1], [0], [0], [1], [0, 0, 1, 1], [], []>} : vector<8x8xf32>, vector<8x8xf32>, vector<8x8xf32> -> vector<8x8xf32>
    %c0_36 = arith.constant 0 : index
    %c24 = arith.constant 24 : index
    %97 = vector.load %arg17[%c0_36, %c24] : memref<16x32xf32, #tpu.memory_space<vmem>>, vector<8x8xf32>
    tpu.vector_store %arg17[%c0_36, %c24], %96 {strides = array<i32>} : memref<16x32xf32, #tpu.memory_space<vmem>>, vector<8x8xf32>,
    %c1 = arith.constant 1 : index
    %c0_37 = arith.constant 0 : index
    %98 = vector.load %arg1[%c1, %c0_37] : memref<2x8xf32, #tpu.memory_space<vmem>>, vector<1x8xf32>
    %cst_38 = arith.constant 5.000000e-01 : f32
    %99 = vector.broadcast %cst_38 : f32 to vector<1x8xf32>
    %100 = arith.cmpf ogt, %98, %99 : vector<1x8xf32>
    %101 = vector.broadcast %100 : vector<1x8xi1> to vector<8x8xi1>
    %102 = arith.andi %3, %101 : vector<8x8xi1>
    %cst_39 = arith.constant 0.000000e+00 : f32
    %cst_40 = arith.constant -1.000000e+09 : f32
    %103 = vector.broadcast %cst_39 : f32 to vector<8x8xf32>
    %104 = vector.broadcast %cst_40 : f32 to vector<8x8xf32>
    %105 = arith.select %102, %103, %104 : vector<8x8xi1>, vector<8x8xf32>
    %106 = vector.extract_strided_slice %11 {offsets = [8, 0], sizes = [8, 8], strides = [1, 1]} : vector<16x32xf32> to vector<8x8xf32>
    %107 = vector.extract_strided_slice %12 {offsets = [8, 0], sizes = [8, 8], strides = [1, 1]} : vector<16x32xf32> to vector<8x8xf32>
    %108 = vector.extract_strided_slice %13 {offsets = [8, 0], sizes = [8, 8], strides = [1, 1]} : vector<16x32xf32> to vector<8x8xf32>
    %cst_41 = arith.constant dense<0.000000e+00> : vector<8x8xf32>
    %109 = tpu.matmul %106, %107, %cst_41 {dimension_numbers = #tpu.dot_dimension_numbers<[1], [1], [0], [0], [0, 0, 1, 0], [], []>} : vector<8x8xf32>, vector<8x8xf32>, vector<8x8xf32> -> vector<8x8xf32>
    %cst_42 = arith.constant 0.353553385 : f32
    %110 = vector.broadcast %cst_42 : f32 to vector<8x8xf32>
    %111 = arith.mulf %109, %110 : vector<8x8xf32>
    %112 = arith.addf %111, %105 : vector<8x8xf32>
    %cst_43 = arith.constant dense<0xFF800000> : vector<8xf32>
    %113 = vector.multi_reduction <maximumf>, %112, %cst_43 [1] : vector<8x8xf32> to vector<8xf32>
    %114 = vector.shape_cast %113 : vector<8xf32> to vector<8x1xf32>
    %115 = vector.broadcast %114 : vector<8x1xf32> to vector<8x8xf32>
    %116 = arith.subf %112, %115 : vector<8x8xf32>
    %117 = math.exp %116 : vector<8x8xf32>
    %cst_44 = arith.constant dense<0.000000e+00> : vector<8xf32>
    %118 = vector.multi_reduction <add>, %117, %cst_44 [1] : vector<8x8xf32> to vector<8xf32>
    %119 = vector.shape_cast %118 : vector<8xf32> to vector<8x1xf32>
    %120 = tpu.reciprocal %119 {approx = true} : vector<8x1xf32> -> vector<8x1xf32>
    %121 = vector.broadcast %120 : vector<8x1xf32> to vector<8x8xf32>
    %122 = arith.mulf %117, %121 : vector<8x8xf32>
    %cst_45 = arith.constant dense<0.000000e+00> : vector<8x8xf32>
    %123 = tpu.matmul %122, %108, %cst_45 {dimension_numbers = #tpu.dot_dimension_numbers<[1], [0], [0], [1], [0, 0, 1, 1], [], []>} : vector<8x8xf32>, vector<8x8xf32>, vector<8x8xf32> -> vector<8x8xf32>
    %c8_46 = arith.constant 8 : index
    %c0_47 = arith.constant 0 : index
    %124 = vector.load %arg17[%c8_46, %c0_47] : memref<16x32xf32, #tpu.memory_space<vmem>>, vector<8x8xf32>
    tpu.vector_store %arg17[%c8_46, %c0_47], %123 {strides = array<i32>} : memref<16x32xf32, #tpu.memory_space<vmem>>, vector<8x8xf32>,
    %125 = vector.extract_strided_slice %11 {offsets = [8, 8], sizes = [8, 8], strides = [1, 1]} : vector<16x32xf32> to vector<8x8xf32>
    %126 = vector.extract_strided_slice %12 {offsets = [8, 8], sizes = [8, 8], strides = [1, 1]} : vector<16x32xf32> to vector<8x8xf32>
    %127 = vector.extract_strided_slice %13 {offsets = [8, 8], sizes = [8, 8], strides = [1, 1]} : vector<16x32xf32> to vector<8x8xf32>
    %cst_48 = arith.constant dense<0.000000e+00> : vector<8x8xf32>
    %128 = tpu.matmul %125, %126, %cst_48 {dimension_numbers = #tpu.dot_dimension_numbers<[1], [1], [0], [0], [0, 0, 1, 0], [], []>} : vector<8x8xf32>, vector<8x8xf32>, vector<8x8xf32> -> vector<8x8xf32>
    %cst_49 = arith.constant 0.353553385 : f32
    %129 = vector.broadcast %cst_49 : f32 to vector<8x8xf32>
    %130 = arith.mulf %128, %129 : vector<8x8xf32>
    %131 = arith.addf %130, %105 : vector<8x8xf32>
    %cst_50 = arith.constant dense<0xFF800000> : vector<8xf32>
    %132 = vector.multi_reduction <maximumf>, %131, %cst_50 [1] : vector<8x8xf32> to vector<8xf32>
    %133 = vector.shape_cast %132 : vector<8xf32> to vector<8x1xf32>
    %134 = vector.broadcast %133 : vector<8x1xf32> to vector<8x8xf32>
    %135 = arith.subf %131, %134 : vector<8x8xf32>
    %136 = math.exp %135 : vector<8x8xf32>
    %cst_51 = arith.constant dense<0.000000e+00> : vector<8xf32>
    %137 = vector.multi_reduction <add>, %136, %cst_51 [1] : vector<8x8xf32> to vector<8xf32>
    %138 = vector.shape_cast %137 : vector<8xf32> to vector<8x1xf32>
    %139 = tpu.reciprocal %138 {approx = true} : vector<8x1xf32> -> vector<8x1xf32>
    %140 = vector.broadcast %139 : vector<8x1xf32> to vector<8x8xf32>
    %141 = arith.mulf %136, %140 : vector<8x8xf32>
    %cst_52 = arith.constant dense<0.000000e+00> : vector<8x8xf32>
    %142 = tpu.matmul %141, %127, %cst_52 {dimension_numbers = #tpu.dot_dimension_numbers<[1], [0], [0], [1], [0, 0, 1, 1], [], []>} : vector<8x8xf32>, vector<8x8xf32>, vector<8x8xf32> -> vector<8x8xf32>
    %c8_53 = arith.constant 8 : index
    %c8_54 = arith.constant 8 : index
    %143 = vector.load %arg17[%c8_53, %c8_54] : memref<16x32xf32, #tpu.memory_space<vmem>>, vector<8x8xf32>
    tpu.vector_store %arg17[%c8_53, %c8_54], %142 {strides = array<i32>} : memref<16x32xf32, #tpu.memory_space<vmem>>, vector<8x8xf32>,
    %144 = vector.extract_strided_slice %11 {offsets = [8, 16], sizes = [8, 8], strides = [1, 1]} : vector<16x32xf32> to vector<8x8xf32>
    %145 = vector.extract_strided_slice %12 {offsets = [8, 16], sizes = [8, 8], strides = [1, 1]} : vector<16x32xf32> to vector<8x8xf32>
    %146 = vector.extract_strided_slice %13 {offsets = [8, 16], sizes = [8, 8], strides = [1, 1]} : vector<16x32xf32> to vector<8x8xf32>
    %cst_55 = arith.constant dense<0.000000e+00> : vector<8x8xf32>
    %147 = tpu.matmul %144, %145, %cst_55 {dimension_numbers = #tpu.dot_dimension_numbers<[1], [1], [0], [0], [0, 0, 1, 0], [], []>} : vector<8x8xf32>, vector<8x8xf32>, vector<8x8xf32> -> vector<8x8xf32>
    %cst_56 = arith.constant 0.353553385 : f32
    %148 = vector.broadcast %cst_56 : f32 to vector<8x8xf32>
    %149 = arith.mulf %147, %148 : vector<8x8xf32>
    %150 = arith.addf %149, %105 : vector<8x8xf32>
    %cst_57 = arith.constant dense<0xFF800000> : vector<8xf32>
    %151 = vector.multi_reduction <maximumf>, %150, %cst_57 [1] : vector<8x8xf32> to vector<8xf32>
    %152 = vector.shape_cast %151 : vector<8xf32> to vector<8x1xf32>
    %153 = vector.broadcast %152 : vector<8x1xf32> to vector<8x8xf32>
    %154 = arith.subf %150, %153 : vector<8x8xf32>
    %155 = math.exp %154 : vector<8x8xf32>
    %cst_58 = arith.constant dense<0.000000e+00> : vector<8xf32>
    %156 = vector.multi_reduction <add>, %155, %cst_58 [1] : vector<8x8xf32> to vector<8xf32>
    %157 = vector.shape_cast %156 : vector<8xf32> to vector<8x1xf32>
    %158 = tpu.reciprocal %157 {approx = true} : vector<8x1xf32> -> vector<8x1xf32>
    %159 = vector.broadcast %158 : vector<8x1xf32> to vector<8x8xf32>
    %160 = arith.mulf %155, %159 : vector<8x8xf32>
    %cst_59 = arith.constant dense<0.000000e+00> : vector<8x8xf32>
    %161 = tpu.matmul %160, %146, %cst_59 {dimension_numbers = #tpu.dot_dimension_numbers<[1], [0], [0], [1], [0, 0, 1, 1], [], []>} : vector<8x8xf32>, vector<8x8xf32>, vector<8x8xf32> -> vector<8x8xf32>
    %c8_60 = arith.constant 8 : index
    %c16_61 = arith.constant 16 : index
    %162 = vector.load %arg17[%c8_60, %c16_61] : memref<16x32xf32, #tpu.memory_space<vmem>>, vector<8x8xf32>
    tpu.vector_store %arg17[%c8_60, %c16_61], %161 {strides = array<i32>} : memref<16x32xf32, #tpu.memory_space<vmem>>, vector<8x8xf32>,
    %163 = vector.extract_strided_slice %11 {offsets = [8, 24], sizes = [8, 8], strides = [1, 1]} : vector<16x32xf32> to vector<8x8xf32>
    %164 = vector.extract_strided_slice %12 {offsets = [8, 24], sizes = [8, 8], strides = [1, 1]} : vector<16x32xf32> to vector<8x8xf32>
    %165 = vector.extract_strided_slice %13 {offsets = [8, 24], sizes = [8, 8], strides = [1, 1]} : vector<16x32xf32> to vector<8x8xf32>
    %cst_62 = arith.constant dense<0.000000e+00> : vector<8x8xf32>
    %166 = tpu.matmul %163, %164, %cst_62 {dimension_numbers = #tpu.dot_dimension_numbers<[1], [1], [0], [0], [0, 0, 1, 0], [], []>} : vector<8x8xf32>, vector<8x8xf32>, vector<8x8xf32> -> vector<8x8xf32>
    %cst_63 = arith.constant 0.353553385 : f32
    %167 = vector.broadcast %cst_63 : f32 to vector<8x8xf32>
    %168 = arith.mulf %166, %167 : vector<8x8xf32>
    %169 = arith.addf %168, %105 : vector<8x8xf32>
    %cst_64 = arith.constant dense<0xFF800000> : vector<8xf32>
    %170 = vector.multi_reduction <maximumf>, %169, %cst_64 [1] : vector<8x8xf32> to vector<8xf32>
    %171 = vector.shape_cast %170 : vector<8xf32> to vector<8x1xf32>
    %172 = vector.broadcast %171 : vector<8x1xf32> to vector<8x8xf32>
    %173 = arith.subf %169, %172 : vector<8x8xf32>
    %174 = math.exp %173 : vector<8x8xf32>
    %cst_65 = arith.constant dense<0.000000e+00> : vector<8xf32>
    %175 = vector.multi_reduction <add>, %174, %cst_65 [1] : vector<8x8xf32> to vector<8xf32>
    %176 = vector.shape_cast %175 : vector<8xf32> to vector<8x1xf32>
    %177 = tpu.reciprocal %176 {approx = true} : vector<8x1xf32> -> vector<8x1xf32>
    %178 = vector.broadcast %177 : vector<8x1xf32> to vector<8x8xf32>
    %179 = arith.mulf %174, %178 : vector<8x8xf32>
    %cst_66 = arith.constant dense<0.000000e+00> : vector<8x8xf32>
    %180 = tpu.matmul %179, %165, %cst_66 {dimension_numbers = #tpu.dot_dimension_numbers<[1], [0], [0], [1], [0, 0, 1, 1], [], []>} : vector<8x8xf32>, vector<8x8xf32>, vector<8x8xf32> -> vector<8x8xf32>
    %c8_67 = arith.constant 8 : index
    %c24_68 = arith.constant 24 : index
    %181 = vector.load %arg17[%c8_67, %c24_68] : memref<16x32xf32, #tpu.memory_space<vmem>>, vector<8x8xf32>
    tpu.vector_store %arg17[%c8_67, %c24_68], %180 {strides = array<i32>} : memref<16x32xf32, #tpu.memory_space<vmem>>, vector<8x8xf32>,
    %c0_69 = arith.constant 0 : index
    %c0_70 = arith.constant 0 : index
    %182 = vector.load %arg17[%c0_69, %c0_70] : memref<16x32xf32, #tpu.memory_space<vmem>>, vector<16x32xf32>
    %c0_71 = arith.constant 0 : index
    %c0_72 = arith.constant 0 : index
    %c0_73 = arith.constant 0 : index
    %183 = vector.load %arg4[%c0_71, %c0_72, %c0_73] : memref<2x32x32xf32, #tpu.memory_space<vmem>>, vector<1x32x32xf32>
    %184 = vector.shape_cast %183 : vector<1x32x32xf32> to vector<32x32xf32>
    %cst_74 = arith.constant dense<0.000000e+00> : vector<16x32xf32>
    %185 = tpu.matmul %182, %184, %cst_74 {dimension_numbers = #tpu.dot_dimension_numbers<[1], [0], [0], [1], [0, 0, 1, 1], [], []>} : vector<16x32xf32>, vector<32x32xf32>, vector<16x32xf32> -> vector<16x32xf32>
    %c0_75 = arith.constant 0 : index
    %c0_76 = arith.constant 0 : index
    %c0_77 = arith.constant 0 : index
    %186 = vector.load %arg5[%c0_75, %c0_76, %c0_77] : memref<2x1x32xf32, #tpu.memory_space<vmem>>, vector<1x1x32xf32>
    %187 = vector.shape_cast %186 : vector<1x1x32xf32> to vector<1x32xf32>
    %188 = vector.broadcast %187 : vector<1x32xf32> to vector<16x32xf32>
    %189 = arith.addf %185, %188 : vector<16x32xf32>
    %190 = arith.addf %0, %189 : vector<16x32xf32>
    %c0_78 = arith.constant 0 : index
    %c0_79 = arith.constant 0 : index
    %c0_80 = arith.constant 0 : index
    %191 = vector.load %arg10[%c0_78, %c0_79, %c0_80] : memref<2x1x32xf32, #tpu.memory_space<vmem>>, vector<1x1x32xf32>
    %192 = vector.shape_cast %191 : vector<1x1x32xf32> to vector<1x32xf32>
    %c0_81 = arith.constant 0 : index
    %c0_82 = arith.constant 0 : index
    %c0_83 = arith.constant 0 : index
    %193 = vector.load %arg11[%c0_81, %c0_82, %c0_83] : memref<2x1x32xf32, #tpu.memory_space<vmem>>, vector<1x1x32xf32>
    %194 = vector.shape_cast %193 : vector<1x1x32xf32> to vector<1x32xf32>
    %cst_84 = arith.constant dense<0.000000e+00> : vector<16xf32>
    %195 = vector.multi_reduction <add>, %190, %cst_84 [1] : vector<16x32xf32> to vector<16xf32>
    %196 = vector.shape_cast %195 : vector<16xf32> to vector<16x1xf32>
    %cst_85 = arith.constant 3.200000e+01 : f32
    %197 = vector.broadcast %cst_85 : f32 to vector<16x1xf32>
    %198 = arith.divf %196, %197 : vector<16x1xf32>
    %199 = vector.broadcast %198 : vector<16x1xf32> to vector<16x32xf32>
    %200 = arith.subf %190, %199 : vector<16x32xf32>
    %201 = arith.mulf %200, %200 : vector<16x32xf32>
    %cst_86 = arith.constant dense<0.000000e+00> : vector<16xf32>
    %202 = vector.multi_reduction <add>, %201, %cst_86 [1] : vector<16x32xf32> to vector<16xf32>
    %203 = vector.shape_cast %202 : vector<16xf32> to vector<16x1xf32>
    %cst_87 = arith.constant 3.200000e+01 : f32
    %204 = vector.broadcast %cst_87 : f32 to vector<16x1xf32>
    %205 = arith.divf %203, %204 : vector<16x1xf32>
    %cst_88 = arith.constant 9.99999974E-6 : f32
    %206 = vector.broadcast %cst_88 : f32 to vector<16x1xf32>
    %207 = arith.addf %205, %206 : vector<16x1xf32>
    %208 = math.rsqrt %207 : vector<16x1xf32>
    %209 = vector.broadcast %198 : vector<16x1xf32> to vector<16x32xf32>
    %210 = arith.subf %190, %209 : vector<16x32xf32>
    %211 = vector.broadcast %208 : vector<16x1xf32> to vector<16x32xf32>
    %212 = arith.mulf %210, %211 : vector<16x32xf32>
    %213 = vector.broadcast %192 : vector<1x32xf32> to vector<16x32xf32>
    %214 = arith.mulf %212, %213 : vector<16x32xf32>
    %215 = vector.broadcast %194 : vector<1x32xf32> to vector<16x32xf32>
    %216 = arith.addf %214, %215 : vector<16x32xf32>
    %c0_89 = arith.constant 0 : index
    %c0_90 = arith.constant 0 : index
    %c0_91 = arith.constant 0 : index
    %217 = vector.load %arg6[%c0_89, %c0_90, %c0_91] : memref<2x32x64xf32, #tpu.memory_space<vmem>>, vector<1x32x64xf32>
    %218 = vector.shape_cast %217 : vector<1x32x64xf32> to vector<32x64xf32>
    %cst_92 = arith.constant dense<0.000000e+00> : vector<16x64xf32>
    %219 = tpu.matmul %216, %218, %cst_92 {dimension_numbers = #tpu.dot_dimension_numbers<[1], [0], [0], [1], [0, 0, 1, 1], [], []>} : vector<16x32xf32>, vector<32x64xf32>, vector<16x64xf32> -> vector<16x64xf32>
    %c0_93 = arith.constant 0 : index
    %c0_94 = arith.constant 0 : index
    %c0_95 = arith.constant 0 : index
    %220 = vector.load %arg7[%c0_93, %c0_94, %c0_95] : memref<2x1x64xf32, #tpu.memory_space<vmem>>, vector<1x1x64xf32>
    %221 = vector.shape_cast %220 : vector<1x1x64xf32> to vector<1x64xf32>
    %222 = vector.broadcast %221 : vector<1x64xf32> to vector<16x64xf32>
    %223 = arith.addf %219, %222 : vector<16x64xf32>
    %cst_96 = arith.constant 0.000000e+00 : f32
    %224 = vector.broadcast %cst_96 : f32 to vector<16x64xf32>
    %225 = arith.maximumf %223, %224 : vector<16x64xf32>
    %c0_97 = arith.constant 0 : index
    %c0_98 = arith.constant 0 : index
    %c0_99 = arith.constant 0 : index
    %226 = vector.load %arg8[%c0_97, %c0_98, %c0_99] : memref<2x64x32xf32, #tpu.memory_space<vmem>>, vector<1x64x32xf32>
    %227 = vector.shape_cast %226 : vector<1x64x32xf32> to vector<64x32xf32>
    %cst_100 = arith.constant dense<0.000000e+00> : vector<16x32xf32>
    %228 = tpu.matmul %225, %227, %cst_100 {dimension_numbers = #tpu.dot_dimension_numbers<[1], [0], [0], [1], [0, 0, 1, 1], [], []>} : vector<16x64xf32>, vector<64x32xf32>, vector<16x32xf32> -> vector<16x32xf32>
    %c0_101 = arith.constant 0 : index
    %c0_102 = arith.constant 0 : index
    %c0_103 = arith.constant 0 : index
    %229 = vector.load %arg9[%c0_101, %c0_102, %c0_103] : memref<2x1x32xf32, #tpu.memory_space<vmem>>, vector<1x1x32xf32>
    %230 = vector.shape_cast %229 : vector<1x1x32xf32> to vector<1x32xf32>
    %231 = vector.broadcast %230 : vector<1x32xf32> to vector<16x32xf32>
    %232 = arith.addf %228, %231 : vector<16x32xf32>
    %233 = arith.addf %216, %232 : vector<16x32xf32>
    %c0_104 = arith.constant 0 : index
    %c0_105 = arith.constant 0 : index
    %c0_106 = arith.constant 0 : index
    %234 = vector.load %arg12[%c0_104, %c0_105, %c0_106] : memref<2x1x32xf32, #tpu.memory_space<vmem>>, vector<1x1x32xf32>
    %235 = vector.shape_cast %234 : vector<1x1x32xf32> to vector<1x32xf32>
    %c0_107 = arith.constant 0 : index
    %c0_108 = arith.constant 0 : index
    %c0_109 = arith.constant 0 : index
    %236 = vector.load %arg13[%c0_107, %c0_108, %c0_109] : memref<2x1x32xf32, #tpu.memory_space<vmem>>, vector<1x1x32xf32>
    %237 = vector.shape_cast %236 : vector<1x1x32xf32> to vector<1x32xf32>
    %cst_110 = arith.constant dense<0.000000e+00> : vector<16xf32>
    %238 = vector.multi_reduction <add>, %233, %cst_110 [1] : vector<16x32xf32> to vector<16xf32>
    %239 = vector.shape_cast %238 : vector<16xf32> to vector<16x1xf32>
    %cst_111 = arith.constant 3.200000e+01 : f32
    %240 = vector.broadcast %cst_111 : f32 to vector<16x1xf32>
    %241 = arith.divf %239, %240 : vector<16x1xf32>
    %242 = vector.broadcast %241 : vector<16x1xf32> to vector<16x32xf32>
    %243 = arith.subf %233, %242 : vector<16x32xf32>
    %244 = arith.mulf %243, %243 : vector<16x32xf32>
    %cst_112 = arith.constant dense<0.000000e+00> : vector<16xf32>
    %245 = vector.multi_reduction <add>, %244, %cst_112 [1] : vector<16x32xf32> to vector<16xf32>
    %246 = vector.shape_cast %245 : vector<16xf32> to vector<16x1xf32>
    %cst_113 = arith.constant 3.200000e+01 : f32
    %247 = vector.broadcast %cst_113 : f32 to vector<16x1xf32>
    %248 = arith.divf %246, %247 : vector<16x1xf32>
    %cst_114 = arith.constant 9.99999974E-6 : f32
    %249 = vector.broadcast %cst_114 : f32 to vector<16x1xf32>
    %250 = arith.addf %248, %249 : vector<16x1xf32>
    %251 = math.rsqrt %250 : vector<16x1xf32>
    %252 = vector.broadcast %241 : vector<16x1xf32> to vector<16x32xf32>
    %253 = arith.subf %233, %252 : vector<16x32xf32>
    %254 = vector.broadcast %251 : vector<16x1xf32> to vector<16x32xf32>
    %255 = arith.mulf %253, %254 : vector<16x32xf32>
    %256 = vector.broadcast %235 : vector<1x32xf32> to vector<16x32xf32>
    %257 = arith.mulf %255, %256 : vector<16x32xf32>
    %258 = vector.broadcast %237 : vector<1x32xf32> to vector<16x32xf32>
    %259 = arith.addf %257, %258 : vector<16x32xf32>
    %c1_115 = arith.constant 1 : index
    %c0_116 = arith.constant 0 : index
    %c0_117 = arith.constant 0 : index
    %260 = vector.load %arg2[%c1_115, %c0_116, %c0_117] : memref<2x32x96xf32, #tpu.memory_space<vmem>>, vector<1x32x96xf32>
    %261 = vector.shape_cast %260 : vector<1x32x96xf32> to vector<32x96xf32>
    %cst_118 = arith.constant dense<0.000000e+00> : vector<16x96xf32>
    %262 = tpu.matmul %259, %261, %cst_118 {dimension_numbers = #tpu.dot_dimension_numbers<[1], [0], [0], [1], [0, 0, 1, 1], [], []>} : vector<16x32xf32>, vector<32x96xf32>, vector<16x96xf32> -> vector<16x96xf32>
    %c1_119 = arith.constant 1 : index
    %c0_120 = arith.constant 0 : index
    %c0_121 = arith.constant 0 : index
    %263 = vector.load %arg3[%c1_119, %c0_120, %c0_121] : memref<2x1x96xf32, #tpu.memory_space<vmem>>, vector<1x1x96xf32>
    %264 = vector.shape_cast %263 : vector<1x1x96xf32> to vector<1x96xf32>
    %265 = vector.broadcast %264 : vector<1x96xf32> to vector<16x96xf32>
    %266 = arith.addf %262, %265 : vector<16x96xf32>
    %267 = vector.extract_strided_slice %266 {offsets = [0, 0], sizes = [16, 32], strides = [1, 1]} : vector<16x96xf32> to vector<16x32xf32>
    %268 = vector.extract_strided_slice %266 {offsets = [0, 32], sizes = [16, 32], strides = [1, 1]} : vector<16x96xf32> to vector<16x32xf32>
    %269 = vector.extract_strided_slice %266 {offsets = [0, 64], sizes = [16, 32], strides = [1, 1]} : vector<16x96xf32> to vector<16x32xf32>
    %c0_122 = arith.constant 0 : index
    %c0_123 = arith.constant 0 : index
    %270 = vector.load %arg1[%c0_122, %c0_123] : memref<2x8xf32, #tpu.memory_space<vmem>>, vector<1x8xf32>
    %cst_124 = arith.constant 5.000000e-01 : f32
    %271 = vector.broadcast %cst_124 : f32 to vector<1x8xf32>
    %272 = arith.cmpf ogt, %270, %271 : vector<1x8xf32>
    %273 = vector.broadcast %272 : vector<1x8xi1> to vector<8x8xi1>
    %274 = arith.andi %3, %273 : vector<8x8xi1>
    %cst_125 = arith.constant 0.000000e+00 : f32
    %cst_126 = arith.constant -1.000000e+09 : f32
    %275 = vector.broadcast %cst_125 : f32 to vector<8x8xf32>
    %276 = vector.broadcast %cst_126 : f32 to vector<8x8xf32>
    %277 = arith.select %274, %275, %276 : vector<8x8xi1>, vector<8x8xf32>
    %278 = vector.extract_strided_slice %267 {offsets = [0, 0], sizes = [8, 8], strides = [1, 1]} : vector<16x32xf32> to vector<8x8xf32>
    %279 = vector.extract_strided_slice %268 {offsets = [0, 0], sizes = [8, 8], strides = [1, 1]} : vector<16x32xf32> to vector<8x8xf32>
    %280 = vector.extract_strided_slice %269 {offsets = [0, 0], sizes = [8, 8], strides = [1, 1]} : vector<16x32xf32> to vector<8x8xf32>
    %cst_127 = arith.constant dense<0.000000e+00> : vector<8x8xf32>
    %281 = tpu.matmul %278, %279, %cst_127 {dimension_numbers = #tpu.dot_dimension_numbers<[1], [1], [0], [0], [0, 0, 1, 0], [], []>} : vector<8x8xf32>, vector<8x8xf32>, vector<8x8xf32> -> vector<8x8xf32>
    %cst_128 = arith.constant 0.353553385 : f32
    %282 = vector.broadcast %cst_128 : f32 to vector<8x8xf32>
    %283 = arith.mulf %281, %282 : vector<8x8xf32>
    %284 = arith.addf %283, %277 : vector<8x8xf32>
    %cst_129 = arith.constant dense<0xFF800000> : vector<8xf32>
    %285 = vector.multi_reduction <maximumf>, %284, %cst_129 [1] : vector<8x8xf32> to vector<8xf32>
    %286 = vector.shape_cast %285 : vector<8xf32> to vector<8x1xf32>
    %287 = vector.broadcast %286 : vector<8x1xf32> to vector<8x8xf32>
    %288 = arith.subf %284, %287 : vector<8x8xf32>
    %289 = math.exp %288 : vector<8x8xf32>
    %cst_130 = arith.constant dense<0.000000e+00> : vector<8xf32>
    %290 = vector.multi_reduction <add>, %289, %cst_130 [1] : vector<8x8xf32> to vector<8xf32>
    %291 = vector.shape_cast %290 : vector<8xf32> to vector<8x1xf32>
    %292 = tpu.reciprocal %291 {approx = true} : vector<8x1xf32> -> vector<8x1xf32>
    %293 = vector.broadcast %292 : vector<8x1xf32> to vector<8x8xf32>
    %294 = arith.mulf %289, %293 : vector<8x8xf32>
    %cst_131 = arith.constant dense<0.000000e+00> : vector<8x8xf32>
    %295 = tpu.matmul %294, %280, %cst_131 {dimension_numbers = #tpu.dot_dimension_numbers<[1], [0], [0], [1], [0, 0, 1, 1], [], []>} : vector<8x8xf32>, vector<8x8xf32>, vector<8x8xf32> -> vector<8x8xf32>
    %c0_132 = arith.constant 0 : index
    %c0_133 = arith.constant 0 : index
    %296 = vector.load %arg17[%c0_132, %c0_133] : memref<16x32xf32, #tpu.memory_space<vmem>>, vector<8x8xf32>
    tpu.vector_store %arg17[%c0_132, %c0_133], %295 {strides = array<i32>} : memref<16x32xf32, #tpu.memory_space<vmem>>, vector<8x8xf32>,
    %297 = vector.extract_strided_slice %267 {offsets = [0, 8], sizes = [8, 8], strides = [1, 1]} : vector<16x32xf32> to vector<8x8xf32>
    %298 = vector.extract_strided_slice %268 {offsets = [0, 8], sizes = [8, 8], strides = [1, 1]} : vector<16x32xf32> to vector<8x8xf32>
    %299 = vector.extract_strided_slice %269 {offsets = [0, 8], sizes = [8, 8], strides = [1, 1]} : vector<16x32xf32> to vector<8x8xf32>
    %cst_134 = arith.constant dense<0.000000e+00> : vector<8x8xf32>
    %300 = tpu.matmul %297, %298, %cst_134 {dimension_numbers = #tpu.dot_dimension_numbers<[1], [1], [0], [0], [0, 0, 1, 0], [], []>} : vector<8x8xf32>, vector<8x8xf32>, vector<8x8xf32> -> vector<8x8xf32>
    %cst_135 = arith.constant 0.353553385 : f32
    %301 = vector.broadcast %cst_135 : f32 to vector<8x8xf32>
    %302 = arith.mulf %300, %301 : vector<8x8xf32>
    %303 = arith.addf %302, %277 : vector<8x8xf32>
    %cst_136 = arith.constant dense<0xFF800000> : vector<8xf32>
    %304 = vector.multi_reduction <maximumf>, %303, %cst_136 [1] : vector<8x8xf32> to vector<8xf32>
    %305 = vector.shape_cast %304 : vector<8xf32> to vector<8x1xf32>
    %306 = vector.broadcast %305 : vector<8x1xf32> to vector<8x8xf32>
    %307 = arith.subf %303, %306 : vector<8x8xf32>
    %308 = math.exp %307 : vector<8x8xf32>
    %cst_137 = arith.constant dense<0.000000e+00> : vector<8xf32>
    %309 = vector.multi_reduction <add>, %308, %cst_137 [1] : vector<8x8xf32> to vector<8xf32>
    %310 = vector.shape_cast %309 : vector<8xf32> to vector<8x1xf32>
    %311 = tpu.reciprocal %310 {approx = true} : vector<8x1xf32> -> vector<8x1xf32>
    %312 = vector.broadcast %311 : vector<8x1xf32> to vector<8x8xf32>
    %313 = arith.mulf %308, %312 : vector<8x8xf32>
    %cst_138 = arith.constant dense<0.000000e+00> : vector<8x8xf32>
    %314 = tpu.matmul %313, %299, %cst_138 {dimension_numbers = #tpu.dot_dimension_numbers<[1], [0], [0], [1], [0, 0, 1, 1], [], []>} : vector<8x8xf32>, vector<8x8xf32>, vector<8x8xf32> -> vector<8x8xf32>
    %c0_139 = arith.constant 0 : index
    %c8_140 = arith.constant 8 : index
    %315 = vector.load %arg17[%c0_139, %c8_140] : memref<16x32xf32, #tpu.memory_space<vmem>>, vector<8x8xf32>
    tpu.vector_store %arg17[%c0_139, %c8_140], %314 {strides = array<i32>} : memref<16x32xf32, #tpu.memory_space<vmem>>, vector<8x8xf32>,
    %316 = vector.extract_strided_slice %267 {offsets = [0, 16], sizes = [8, 8], strides = [1, 1]} : vector<16x32xf32> to vector<8x8xf32>
    %317 = vector.extract_strided_slice %268 {offsets = [0, 16], sizes = [8, 8], strides = [1, 1]} : vector<16x32xf32> to vector<8x8xf32>
    %318 = vector.extract_strided_slice %269 {offsets = [0, 16], sizes = [8, 8], strides = [1, 1]} : vector<16x32xf32> to vector<8x8xf32>
    %cst_141 = arith.constant dense<0.000000e+00> : vector<8x8xf32>
    %319 = tpu.matmul %316, %317, %cst_141 {dimension_numbers = #tpu.dot_dimension_numbers<[1], [1], [0], [0], [0, 0, 1, 0], [], []>} : vector<8x8xf32>, vector<8x8xf32>, vector<8x8xf32> -> vector<8x8xf32>
    %cst_142 = arith.constant 0.353553385 : f32
    %320 = vector.broadcast %cst_142 : f32 to vector<8x8xf32>
    %321 = arith.mulf %319, %320 : vector<8x8xf32>
    %322 = arith.addf %321, %277 : vector<8x8xf32>
    %cst_143 = arith.constant dense<0xFF800000> : vector<8xf32>
    %323 = vector.multi_reduction <maximumf>, %322, %cst_143 [1] : vector<8x8xf32> to vector<8xf32>
    %324 = vector.shape_cast %323 : vector<8xf32> to vector<8x1xf32>
    %325 = vector.broadcast %324 : vector<8x1xf32> to vector<8x8xf32>
    %326 = arith.subf %322, %325 : vector<8x8xf32>
    %327 = math.exp %326 : vector<8x8xf32>
    %cst_144 = arith.constant dense<0.000000e+00> : vector<8xf32>
    %328 = vector.multi_reduction <add>, %327, %cst_144 [1] : vector<8x8xf32> to vector<8xf32>
    %329 = vector.shape_cast %328 : vector<8xf32> to vector<8x1xf32>
    %330 = tpu.reciprocal %329 {approx = true} : vector<8x1xf32> -> vector<8x1xf32>
    %331 = vector.broadcast %330 : vector<8x1xf32> to vector<8x8xf32>
    %332 = arith.mulf %327, %331 : vector<8x8xf32>
    %cst_145 = arith.constant dense<0.000000e+00> : vector<8x8xf32>
    %333 = tpu.matmul %332, %318, %cst_145 {dimension_numbers = #tpu.dot_dimension_numbers<[1], [0], [0], [1], [0, 0, 1, 1], [], []>} : vector<8x8xf32>, vector<8x8xf32>, vector<8x8xf32> -> vector<8x8xf32>
    %c0_146 = arith.constant 0 : index
    %c16_147 = arith.constant 16 : index
    %334 = vector.load %arg17[%c0_146, %c16_147] : memref<16x32xf32, #tpu.memory_space<vmem>>, vector<8x8xf32>
    tpu.vector_store %arg17[%c0_146, %c16_147], %333 {strides = array<i32>} : memref<16x32xf32, #tpu.memory_space<vmem>>, vector<8x8xf32>,
    %335 = vector.extract_strided_slice %267 {offsets = [0, 24], sizes = [8, 8], strides = [1, 1]} : vector<16x32xf32> to vector<8x8xf32>
    %336 = vector.extract_strided_slice %268 {offsets = [0, 24], sizes = [8, 8], strides = [1, 1]} : vector<16x32xf32> to vector<8x8xf32>
    %337 = vector.extract_strided_slice %269 {offsets = [0, 24], sizes = [8, 8], strides = [1, 1]} : vector<16x32xf32> to vector<8x8xf32>
    %cst_148 = arith.constant dense<0.000000e+00> : vector<8x8xf32>
    %338 = tpu.matmul %335, %336, %cst_148 {dimension_numbers = #tpu.dot_dimension_numbers<[1], [1], [0], [0], [0, 0, 1, 0], [], []>} : vector<8x8xf32>, vector<8x8xf32>, vector<8x8xf32> -> vector<8x8xf32>
    %cst_149 = arith.constant 0.353553385 : f32
    %339 = vector.broadcast %cst_149 : f32 to vector<8x8xf32>
    %340 = arith.mulf %338, %339 : vector<8x8xf32>
    %341 = arith.addf %340, %277 : vector<8x8xf32>
    %cst_150 = arith.constant dense<0xFF800000> : vector<8xf32>
    %342 = vector.multi_reduction <maximumf>, %341, %cst_150 [1] : vector<8x8xf32> to vector<8xf32>
    %343 = vector.shape_cast %342 : vector<8xf32> to vector<8x1xf32>
    %344 = vector.broadcast %343 : vector<8x1xf32> to vector<8x8xf32>
    %345 = arith.subf %341, %344 : vector<8x8xf32>
    %346 = math.exp %345 : vector<8x8xf32>
    %cst_151 = arith.constant dense<0.000000e+00> : vector<8xf32>
    %347 = vector.multi_reduction <add>, %346, %cst_151 [1] : vector<8x8xf32> to vector<8xf32>
    %348 = vector.shape_cast %347 : vector<8xf32> to vector<8x1xf32>
    %349 = tpu.reciprocal %348 {approx = true} : vector<8x1xf32> -> vector<8x1xf32>
    %350 = vector.broadcast %349 : vector<8x1xf32> to vector<8x8xf32>
    %351 = arith.mulf %346, %350 : vector<8x8xf32>
    %cst_152 = arith.constant dense<0.000000e+00> : vector<8x8xf32>
    %352 = tpu.matmul %351, %337, %cst_152 {dimension_numbers = #tpu.dot_dimension_numbers<[1], [0], [0], [1], [0, 0, 1, 1], [], []>} : vector<8x8xf32>, vector<8x8xf32>, vector<8x8xf32> -> vector<8x8xf32>
    %c0_153 = arith.constant 0 : index
    %c24_154 = arith.constant 24 : index
    %353 = vector.load %arg17[%c0_153, %c24_154] : memref<16x32xf32, #tpu.memory_space<vmem>>, vector<8x8xf32>
    tpu.vector_store %arg17[%c0_153, %c24_154], %352 {strides = array<i32>} : memref<16x32xf32, #tpu.memory_space<vmem>>, vector<8x8xf32>,
    %c1_155 = arith.constant 1 : index
    %c0_156 = arith.constant 0 : index
    %354 = vector.load %arg1[%c1_155, %c0_156] : memref<2x8xf32, #tpu.memory_space<vmem>>, vector<1x8xf32>
    %cst_157 = arith.constant 5.000000e-01 : f32
    %355 = vector.broadcast %cst_157 : f32 to vector<1x8xf32>
    %356 = arith.cmpf ogt, %354, %355 : vector<1x8xf32>
    %357 = vector.broadcast %356 : vector<1x8xi1> to vector<8x8xi1>
    %358 = arith.andi %3, %357 : vector<8x8xi1>
    %cst_158 = arith.constant 0.000000e+00 : f32
    %cst_159 = arith.constant -1.000000e+09 : f32
    %359 = vector.broadcast %cst_158 : f32 to vector<8x8xf32>
    %360 = vector.broadcast %cst_159 : f32 to vector<8x8xf32>
    %361 = arith.select %358, %359, %360 : vector<8x8xi1>, vector<8x8xf32>
    %362 = vector.extract_strided_slice %267 {offsets = [8, 0], sizes = [8, 8], strides = [1, 1]} : vector<16x32xf32> to vector<8x8xf32>
    %363 = vector.extract_strided_slice %268 {offsets = [8, 0], sizes = [8, 8], strides = [1, 1]} : vector<16x32xf32> to vector<8x8xf32>
    %364 = vector.extract_strided_slice %269 {offsets = [8, 0], sizes = [8, 8], strides = [1, 1]} : vector<16x32xf32> to vector<8x8xf32>
    %cst_160 = arith.constant dense<0.000000e+00> : vector<8x8xf32>
    %365 = tpu.matmul %362, %363, %cst_160 {dimension_numbers = #tpu.dot_dimension_numbers<[1], [1], [0], [0], [0, 0, 1, 0], [], []>} : vector<8x8xf32>, vector<8x8xf32>, vector<8x8xf32> -> vector<8x8xf32>
    %cst_161 = arith.constant 0.353553385 : f32
    %366 = vector.broadcast %cst_161 : f32 to vector<8x8xf32>
    %367 = arith.mulf %365, %366 : vector<8x8xf32>
    %368 = arith.addf %367, %361 : vector<8x8xf32>
    %cst_162 = arith.constant dense<0xFF800000> : vector<8xf32>
    %369 = vector.multi_reduction <maximumf>, %368, %cst_162 [1] : vector<8x8xf32> to vector<8xf32>
    %370 = vector.shape_cast %369 : vector<8xf32> to vector<8x1xf32>
    %371 = vector.broadcast %370 : vector<8x1xf32> to vector<8x8xf32>
    %372 = arith.subf %368, %371 : vector<8x8xf32>
    %373 = math.exp %372 : vector<8x8xf32>
    %cst_163 = arith.constant dense<0.000000e+00> : vector<8xf32>
    %374 = vector.multi_reduction <add>, %373, %cst_163 [1] : vector<8x8xf32> to vector<8xf32>
    %375 = vector.shape_cast %374 : vector<8xf32> to vector<8x1xf32>
    %376 = tpu.reciprocal %375 {approx = true} : vector<8x1xf32> -> vector<8x1xf32>
    %377 = vector.broadcast %376 : vector<8x1xf32> to vector<8x8xf32>
    %378 = arith.mulf %373, %377 : vector<8x8xf32>
    %cst_164 = arith.constant dense<0.000000e+00> : vector<8x8xf32>
    %379 = tpu.matmul %378, %364, %cst_164 {dimension_numbers = #tpu.dot_dimension_numbers<[1], [0], [0], [1], [0, 0, 1, 1], [], []>} : vector<8x8xf32>, vector<8x8xf32>, vector<8x8xf32> -> vector<8x8xf32>
    %c8_165 = arith.constant 8 : index
    %c0_166 = arith.constant 0 : index
    %380 = vector.load %arg17[%c8_165, %c0_166] : memref<16x32xf32, #tpu.memory_space<vmem>>, vector<8x8xf32>
    tpu.vector_store %arg17[%c8_165, %c0_166], %379 {strides = array<i32>} : memref<16x32xf32, #tpu.memory_space<vmem>>, vector<8x8xf32>,
    %381 = vector.extract_strided_slice %267 {offsets = [8, 8], sizes = [8, 8], strides = [1, 1]} : vector<16x32xf32> to vector<8x8xf32>
    %382 = vector.extract_strided_slice %268 {offsets = [8, 8], sizes = [8, 8], strides = [1, 1]} : vector<16x32xf32> to vector<8x8xf32>
    %383 = vector.extract_strided_slice %269 {offsets = [8, 8], sizes = [8, 8], strides = [1, 1]} : vector<16x32xf32> to vector<8x8xf32>
    %cst_167 = arith.constant dense<0.000000e+00> : vector<8x8xf32>
    %384 = tpu.matmul %381, %382, %cst_167 {dimension_numbers = #tpu.dot_dimension_numbers<[1], [1], [0], [0], [0, 0, 1, 0], [], []>} : vector<8x8xf32>, vector<8x8xf32>, vector<8x8xf32> -> vector<8x8xf32>
    %cst_168 = arith.constant 0.353553385 : f32
    %385 = vector.broadcast %cst_168 : f32 to vector<8x8xf32>
    %386 = arith.mulf %384, %385 : vector<8x8xf32>
    %387 = arith.addf %386, %361 : vector<8x8xf32>
    %cst_169 = arith.constant dense<0xFF800000> : vector<8xf32>
    %388 = vector.multi_reduction <maximumf>, %387, %cst_169 [1] : vector<8x8xf32> to vector<8xf32>
    %389 = vector.shape_cast %388 : vector<8xf32> to vector<8x1xf32>
    %390 = vector.broadcast %389 : vector<8x1xf32> to vector<8x8xf32>
    %391 = arith.subf %387, %390 : vector<8x8xf32>
    %392 = math.exp %391 : vector<8x8xf32>
    %cst_170 = arith.constant dense<0.000000e+00> : vector<8xf32>
    %393 = vector.multi_reduction <add>, %392, %cst_170 [1] : vector<8x8xf32> to vector<8xf32>
    %394 = vector.shape_cast %393 : vector<8xf32> to vector<8x1xf32>
    %395 = tpu.reciprocal %394 {approx = true} : vector<8x1xf32> -> vector<8x1xf32>
    %396 = vector.broadcast %395 : vector<8x1xf32> to vector<8x8xf32>
    %397 = arith.mulf %392, %396 : vector<8x8xf32>
    %cst_171 = arith.constant dense<0.000000e+00> : vector<8x8xf32>
    %398 = tpu.matmul %397, %383, %cst_171 {dimension_numbers = #tpu.dot_dimension_numbers<[1], [0], [0], [1], [0, 0, 1, 1], [], []>} : vector<8x8xf32>, vector<8x8xf32>, vector<8x8xf32> -> vector<8x8xf32>
    %c8_172 = arith.constant 8 : index
    %c8_173 = arith.constant 8 : index
    %399 = vector.load %arg17[%c8_172, %c8_173] : memref<16x32xf32, #tpu.memory_space<vmem>>, vector<8x8xf32>
    tpu.vector_store %arg17[%c8_172, %c8_173], %398 {strides = array<i32>} : memref<16x32xf32, #tpu.memory_space<vmem>>, vector<8x8xf32>,
    %400 = vector.extract_strided_slice %267 {offsets = [8, 16], sizes = [8, 8], strides = [1, 1]} : vector<16x32xf32> to vector<8x8xf32>
    %401 = vector.extract_strided_slice %268 {offsets = [8, 16], sizes = [8, 8], strides = [1, 1]} : vector<16x32xf32> to vector<8x8xf32>
    %402 = vector.extract_strided_slice %269 {offsets = [8, 16], sizes = [8, 8], strides = [1, 1]} : vector<16x32xf32> to vector<8x8xf32>
    %cst_174 = arith.constant dense<0.000000e+00> : vector<8x8xf32>
    %403 = tpu.matmul %400, %401, %cst_174 {dimension_numbers = #tpu.dot_dimension_numbers<[1], [1], [0], [0], [0, 0, 1, 0], [], []>} : vector<8x8xf32>, vector<8x8xf32>, vector<8x8xf32> -> vector<8x8xf32>
    %cst_175 = arith.constant 0.353553385 : f32
    %404 = vector.broadcast %cst_175 : f32 to vector<8x8xf32>
    %405 = arith.mulf %403, %404 : vector<8x8xf32>
    %406 = arith.addf %405, %361 : vector<8x8xf32>
    %cst_176 = arith.constant dense<0xFF800000> : vector<8xf32>
    %407 = vector.multi_reduction <maximumf>, %406, %cst_176 [1] : vector<8x8xf32> to vector<8xf32>
    %408 = vector.shape_cast %407 : vector<8xf32> to vector<8x1xf32>
    %409 = vector.broadcast %408 : vector<8x1xf32> to vector<8x8xf32>
    %410 = arith.subf %406, %409 : vector<8x8xf32>
    %411 = math.exp %410 : vector<8x8xf32>
    %cst_177 = arith.constant dense<0.000000e+00> : vector<8xf32>
    %412 = vector.multi_reduction <add>, %411, %cst_177 [1] : vector<8x8xf32> to vector<8xf32>
    %413 = vector.shape_cast %412 : vector<8xf32> to vector<8x1xf32>
    %414 = tpu.reciprocal %413 {approx = true} : vector<8x1xf32> -> vector<8x1xf32>
    %415 = vector.broadcast %414 : vector<8x1xf32> to vector<8x8xf32>
    %416 = arith.mulf %411, %415 : vector<8x8xf32>
    %cst_178 = arith.constant dense<0.000000e+00> : vector<8x8xf32>
    %417 = tpu.matmul %416, %402, %cst_178 {dimension_numbers = #tpu.dot_dimension_numbers<[1], [0], [0], [1], [0, 0, 1, 1], [], []>} : vector<8x8xf32>, vector<8x8xf32>, vector<8x8xf32> -> vector<8x8xf32>
    %c8_179 = arith.constant 8 : index
    %c16_180 = arith.constant 16 : index
    %418 = vector.load %arg17[%c8_179, %c16_180] : memref<16x32xf32, #tpu.memory_space<vmem>>, vector<8x8xf32>
    tpu.vector_store %arg17[%c8_179, %c16_180], %417 {strides = array<i32>} : memref<16x32xf32, #tpu.memory_space<vmem>>, vector<8x8xf32>,
    %419 = vector.extract_strided_slice %267 {offsets = [8, 24], sizes = [8, 8], strides = [1, 1]} : vector<16x32xf32> to vector<8x8xf32>
    %420 = vector.extract_strided_slice %268 {offsets = [8, 24], sizes = [8, 8], strides = [1, 1]} : vector<16x32xf32> to vector<8x8xf32>
    %421 = vector.extract_strided_slice %269 {offsets = [8, 24], sizes = [8, 8], strides = [1, 1]} : vector<16x32xf32> to vector<8x8xf32>
    %cst_181 = arith.constant dense<0.000000e+00> : vector<8x8xf32>
    %422 = tpu.matmul %419, %420, %cst_181 {dimension_numbers = #tpu.dot_dimension_numbers<[1], [1], [0], [0], [0, 0, 1, 0], [], []>} : vector<8x8xf32>, vector<8x8xf32>, vector<8x8xf32> -> vector<8x8xf32>
    %cst_182 = arith.constant 0.353553385 : f32
    %423 = vector.broadcast %cst_182 : f32 to vector<8x8xf32>
    %424 = arith.mulf %422, %423 : vector<8x8xf32>
    %425 = arith.addf %424, %361 : vector<8x8xf32>
    %cst_183 = arith.constant dense<0xFF800000> : vector<8xf32>
    %426 = vector.multi_reduction <maximumf>, %425, %cst_183 [1] : vector<8x8xf32> to vector<8xf32>
    %427 = vector.shape_cast %426 : vector<8xf32> to vector<8x1xf32>
    %428 = vector.broadcast %427 : vector<8x1xf32> to vector<8x8xf32>
    %429 = arith.subf %425, %428 : vector<8x8xf32>
    %430 = math.exp %429 : vector<8x8xf32>
    %cst_184 = arith.constant dense<0.000000e+00> : vector<8xf32>
    %431 = vector.multi_reduction <add>, %430, %cst_184 [1] : vector<8x8xf32> to vector<8xf32>
    %432 = vector.shape_cast %431 : vector<8xf32> to vector<8x1xf32>
    %433 = tpu.reciprocal %432 {approx = true} : vector<8x1xf32> -> vector<8x1xf32>
    %434 = vector.broadcast %433 : vector<8x1xf32> to vector<8x8xf32>
    %435 = arith.mulf %430, %434 : vector<8x8xf32>
    %cst_185 = arith.constant dense<0.000000e+00> : vector<8x8xf32>
    %436 = tpu.matmul %435, %421, %cst_185 {dimension_numbers = #tpu.dot_dimension_numbers<[1], [0], [0], [1], [0, 0, 1, 1], [], []>} : vector<8x8xf32>, vector<8x8xf32>, vector<8x8xf32> -> vector<8x8xf32>
    %c8_186 = arith.constant 8 : index
    %c24_187 = arith.constant 24 : index
    %437 = vector.load %arg17[%c8_186, %c24_187] : memref<16x32xf32, #tpu.memory_space<vmem>>, vector<8x8xf32>
    tpu.vector_store %arg17[%c8_186, %c24_187], %436 {strides = array<i32>} : memref<16x32xf32, #tpu.memory_space<vmem>>, vector<8x8xf32>,
    %c0_188 = arith.constant 0 : index
    %c0_189 = arith.constant 0 : index
    %438 = vector.load %arg17[%c0_188, %c0_189] : memref<16x32xf32, #tpu.memory_space<vmem>>, vector<16x32xf32>
    %c1_190 = arith.constant 1 : index
    %c0_191 = arith.constant 0 : index
    %c0_192 = arith.constant 0 : index
    %439 = vector.load %arg4[%c1_190, %c0_191, %c0_192] : memref<2x32x32xf32, #tpu.memory_space<vmem>>, vector<1x32x32xf32>
    %440 = vector.shape_cast %439 : vector<1x32x32xf32> to vector<32x32xf32>
    %cst_193 = arith.constant dense<0.000000e+00> : vector<16x32xf32>
    %441 = tpu.matmul %438, %440, %cst_193 {dimension_numbers = #tpu.dot_dimension_numbers<[1], [0], [0], [1], [0, 0, 1, 1], [], []>} : vector<16x32xf32>, vector<32x32xf32>, vector<16x32xf32> -> vector<16x32xf32>
    %c1_194 = arith.constant 1 : index
    %c0_195 = arith.constant 0 : index
    %c0_196 = arith.constant 0 : index
    %442 = vector.load %arg5[%c1_194, %c0_195, %c0_196] : memref<2x1x32xf32, #tpu.memory_space<vmem>>, vector<1x1x32xf32>
    %443 = vector.shape_cast %442 : vector<1x1x32xf32> to vector<1x32xf32>
    %444 = vector.broadcast %443 : vector<1x32xf32> to vector<16x32xf32>
    %445 = arith.addf %441, %444 : vector<16x32xf32>
    %446 = arith.addf %259, %445 : vector<16x32xf32>
    %c1_197 = arith.constant 1 : index
    %c0_198 = arith.constant 0 : index
    %c0_199 = arith.constant 0 : index
    %447 = vector.load %arg10[%c1_197, %c0_198, %c0_199] : memref<2x1x32xf32, #tpu.memory_space<vmem>>, vector<1x1x32xf32>
    %448 = vector.shape_cast %447 : vector<1x1x32xf32> to vector<1x32xf32>
    %c1_200 = arith.constant 1 : index
    %c0_201 = arith.constant 0 : index
    %c0_202 = arith.constant 0 : index
    %449 = vector.load %arg11[%c1_200, %c0_201, %c0_202] : memref<2x1x32xf32, #tpu.memory_space<vmem>>, vector<1x1x32xf32>
    %450 = vector.shape_cast %449 : vector<1x1x32xf32> to vector<1x32xf32>
    %cst_203 = arith.constant dense<0.000000e+00> : vector<16xf32>
    %451 = vector.multi_reduction <add>, %446, %cst_203 [1] : vector<16x32xf32> to vector<16xf32>
    %452 = vector.shape_cast %451 : vector<16xf32> to vector<16x1xf32>
    %cst_204 = arith.constant 3.200000e+01 : f32
    %453 = vector.broadcast %cst_204 : f32 to vector<16x1xf32>
    %454 = arith.divf %452, %453 : vector<16x1xf32>
    %455 = vector.broadcast %454 : vector<16x1xf32> to vector<16x32xf32>
    %456 = arith.subf %446, %455 : vector<16x32xf32>
    %457 = arith.mulf %456, %456 : vector<16x32xf32>
    %cst_205 = arith.constant dense<0.000000e+00> : vector<16xf32>
    %458 = vector.multi_reduction <add>, %457, %cst_205 [1] : vector<16x32xf32> to vector<16xf32>
    %459 = vector.shape_cast %458 : vector<16xf32> to vector<16x1xf32>
    %cst_206 = arith.constant 3.200000e+01 : f32
    %460 = vector.broadcast %cst_206 : f32 to vector<16x1xf32>
    %461 = arith.divf %459, %460 : vector<16x1xf32>
    %cst_207 = arith.constant 9.99999974E-6 : f32
    %462 = vector.broadcast %cst_207 : f32 to vector<16x1xf32>
    %463 = arith.addf %461, %462 : vector<16x1xf32>
    %464 = math.rsqrt %463 : vector<16x1xf32>
    %465 = vector.broadcast %454 : vector<16x1xf32> to vector<16x32xf32>
    %466 = arith.subf %446, %465 : vector<16x32xf32>
    %467 = vector.broadcast %464 : vector<16x1xf32> to vector<16x32xf32>
    %468 = arith.mulf %466, %467 : vector<16x32xf32>
    %469 = vector.broadcast %448 : vector<1x32xf32> to vector<16x32xf32>
    %470 = arith.mulf %468, %469 : vector<16x32xf32>
    %471 = vector.broadcast %450 : vector<1x32xf32> to vector<16x32xf32>
    %472 = arith.addf %470, %471 : vector<16x32xf32>
    %c1_208 = arith.constant 1 : index
    %c0_209 = arith.constant 0 : index
    %c0_210 = arith.constant 0 : index
    %473 = vector.load %arg6[%c1_208, %c0_209, %c0_210] : memref<2x32x64xf32, #tpu.memory_space<vmem>>, vector<1x32x64xf32>
    %474 = vector.shape_cast %473 : vector<1x32x64xf32> to vector<32x64xf32>
    %cst_211 = arith.constant dense<0.000000e+00> : vector<16x64xf32>
    %475 = tpu.matmul %472, %474, %cst_211 {dimension_numbers = #tpu.dot_dimension_numbers<[1], [0], [0], [1], [0, 0, 1, 1], [], []>} : vector<16x32xf32>, vector<32x64xf32>, vector<16x64xf32> -> vector<16x64xf32>
    %c1_212 = arith.constant 1 : index
    %c0_213 = arith.constant 0 : index
    %c0_214 = arith.constant 0 : index
    %476 = vector.load %arg7[%c1_212, %c0_213, %c0_214] : memref<2x1x64xf32, #tpu.memory_space<vmem>>, vector<1x1x64xf32>
    %477 = vector.shape_cast %476 : vector<1x1x64xf32> to vector<1x64xf32>
    %478 = vector.broadcast %477 : vector<1x64xf32> to vector<16x64xf32>
    %479 = arith.addf %475, %478 : vector<16x64xf32>
    %cst_215 = arith.constant 0.000000e+00 : f32
    %480 = vector.broadcast %cst_215 : f32 to vector<16x64xf32>
    %481 = arith.maximumf %479, %480 : vector<16x64xf32>
    %c1_216 = arith.constant 1 : index
    %c0_217 = arith.constant 0 : index
    %c0_218 = arith.constant 0 : index
    %482 = vector.load %arg8[%c1_216, %c0_217, %c0_218] : memref<2x64x32xf32, #tpu.memory_space<vmem>>, vector<1x64x32xf32>
    %483 = vector.shape_cast %482 : vector<1x64x32xf32> to vector<64x32xf32>
    %cst_219 = arith.constant dense<0.000000e+00> : vector<16x32xf32>
    %484 = tpu.matmul %481, %483, %cst_219 {dimension_numbers = #tpu.dot_dimension_numbers<[1], [0], [0], [1], [0, 0, 1, 1], [], []>} : vector<16x64xf32>, vector<64x32xf32>, vector<16x32xf32> -> vector<16x32xf32>
    %c1_220 = arith.constant 1 : index
    %c0_221 = arith.constant 0 : index
    %c0_222 = arith.constant 0 : index
    %485 = vector.load %arg9[%c1_220, %c0_221, %c0_222] : memref<2x1x32xf32, #tpu.memory_space<vmem>>, vector<1x1x32xf32>
    %486 = vector.shape_cast %485 : vector<1x1x32xf32> to vector<1x32xf32>
    %487 = vector.broadcast %486 : vector<1x32xf32> to vector<16x32xf32>
    %488 = arith.addf %484, %487 : vector<16x32xf32>
    %489 = arith.addf %472, %488 : vector<16x32xf32>
    %c1_223 = arith.constant 1 : index
    %c0_224 = arith.constant 0 : index
    %c0_225 = arith.constant 0 : index
    %490 = vector.load %arg12[%c1_223, %c0_224, %c0_225] : memref<2x1x32xf32, #tpu.memory_space<vmem>>, vector<1x1x32xf32>
    %491 = vector.shape_cast %490 : vector<1x1x32xf32> to vector<1x32xf32>
    %c1_226 = arith.constant 1 : index
    %c0_227 = arith.constant 0 : index
    %c0_228 = arith.constant 0 : index
    %492 = vector.load %arg13[%c1_226, %c0_227, %c0_228] : memref<2x1x32xf32, #tpu.memory_space<vmem>>, vector<1x1x32xf32>
    %493 = vector.shape_cast %492 : vector<1x1x32xf32> to vector<1x32xf32>
    %cst_229 = arith.constant dense<0.000000e+00> : vector<16xf32>
    %494 = vector.multi_reduction <add>, %489, %cst_229 [1] : vector<16x32xf32> to vector<16xf32>
    %495 = vector.shape_cast %494 : vector<16xf32> to vector<16x1xf32>
    %cst_230 = arith.constant 3.200000e+01 : f32
    %496 = vector.broadcast %cst_230 : f32 to vector<16x1xf32>
    %497 = arith.divf %495, %496 : vector<16x1xf32>
    %498 = vector.broadcast %497 : vector<16x1xf32> to vector<16x32xf32>
    %499 = arith.subf %489, %498 : vector<16x32xf32>
    %500 = arith.mulf %499, %499 : vector<16x32xf32>
    %cst_231 = arith.constant dense<0.000000e+00> : vector<16xf32>
    %501 = vector.multi_reduction <add>, %500, %cst_231 [1] : vector<16x32xf32> to vector<16xf32>
    %502 = vector.shape_cast %501 : vector<16xf32> to vector<16x1xf32>
    %cst_232 = arith.constant 3.200000e+01 : f32
    %503 = vector.broadcast %cst_232 : f32 to vector<16x1xf32>
    %504 = arith.divf %502, %503 : vector<16x1xf32>
    %cst_233 = arith.constant 9.99999974E-6 : f32
    %505 = vector.broadcast %cst_233 : f32 to vector<16x1xf32>
    %506 = arith.addf %504, %505 : vector<16x1xf32>
    %507 = math.rsqrt %506 : vector<16x1xf32>
    %508 = vector.broadcast %497 : vector<16x1xf32> to vector<16x32xf32>
    %509 = arith.subf %489, %508 : vector<16x32xf32>
    %510 = vector.broadcast %507 : vector<16x1xf32> to vector<16x32xf32>
    %511 = arith.mulf %509, %510 : vector<16x32xf32>
    %512 = vector.broadcast %491 : vector<1x32xf32> to vector<16x32xf32>
    %513 = arith.mulf %511, %512 : vector<16x32xf32>
    %514 = vector.broadcast %493 : vector<1x32xf32> to vector<16x32xf32>
    %515 = arith.addf %513, %514 : vector<16x32xf32>
    %c0_234 = arith.constant 0 : index
    %c0_235 = arith.constant 0 : index
    %516 = vector.load %arg14[%c0_234, %c0_235] : memref<32x128xf32, #tpu.memory_space<vmem>>, vector<32x128xf32>
    %cst_236 = arith.constant dense<0.000000e+00> : vector<16x128xf32>
    %517 = tpu.matmul %515, %516, %cst_236 {dimension_numbers = #tpu.dot_dimension_numbers<[1], [0], [0], [1], [0, 0, 1, 1], [], []>} : vector<16x32xf32>, vector<32x128xf32>, vector<16x128xf32> -> vector<16x128xf32>
    %c0_237 = arith.constant 0 : index
    %c0_238 = arith.constant 0 : index
    %518 = vector.load %arg15[%c0_237, %c0_238] : memref<1x128xf32, #tpu.memory_space<vmem>>, vector<1x128xf32>
    %519 = vector.broadcast %518 : vector<1x128xf32> to vector<16x128xf32>
    %520 = arith.addf %517, %519 : vector<16x128xf32>
    %c0_239 = arith.constant 0 : index
    %c0_240 = arith.constant 0 : index
    %521 = vector.load %arg16[%c0_239, %c0_240] : memref<16x128xf32, #tpu.memory_space<vmem>>, vector<16x128xf32>
    tpu.vector_store %arg16[%c0_239, %c0_240], %520 {strides = array<i32>} : memref<16x128xf32, #tpu.memory_space<vmem>>, vector<16x128xf32>,
    return
  }
}

</mosaic_0001>

<bundles_post_ra>
// kernel: tpu_custom_call.1
= control target key start
LH: loop header
LB: loop body
LE: loop exit
PB: predicated region body
PF: predicated region fallthrough
CT: control target
= control target key end

     0   :  { %s5629_s0 = inlined_call_operand.hbm [shape: f32[16,32], index: 0, kind: input, shape index: {}]   ;;  %s5630_s1 = inlined_call_operand.vmem [shape: f32[2,8], index: 1, kind: input, shape index: {}]   ;;  %s5631_s2 = inlined_call_operand.vmem [shape: f32[2,32,96], index: 2, kind: input, shape index: {}]   ;;  %s5632_s3 = inlined_call_operand.hbm [shape: f32[2,1,96], index: 3, kind: input, shape index: {}]   ;;  %s5633_s4 = inlined_call_operand.vmem [shape: f32[2,32,32], index: 4, kind: input, shape index: {}]   ;;  %s5634_s5 = inlined_call_operand.hbm [shape: f32[2,1,32], index: 5, kind: input, shape index: {}]   ;;  %s5635_s6 = inlined_call_operand.vmem [shape: f32[2,32,64], index: 6, kind: input, shape index: {}]   ;;  %s5636_s7 = inlined_call_operand.hbm [shape: f32[2,1,64], index: 7, kind: input, shape index: {}]   ;;  %s5637_s8 = inlined_call_operand.vmem [shape: f32[2,64,32], index: 8, kind: input, shape index: {}]   ;;  %s5638_s9 = inlined_call_operand.hbm [shape: f32[2,1,32], index: 9, kind: input, shape index: {}]   ;;  %s5639_s10 = inlined_call_operand.vmem [shape: f32[2,1,32], index: 10, kind: input, shape index: {}]   ;;  %s5640_s11 = inlined_call_operand.vmem [shape: f32[2,1,32], index: 11, kind: input, shape index: {}]   ;;  %s5641_s12 = inlined_call_operand.vmem [shape: f32[2,1,32], index: 12, kind: input, shape index: {}]   ;;  %s5642_s13 = inlined_call_operand.vmem [shape: f32[2,1,32], index: 13, kind: input, shape index: {}]   ;;  %s5643_s14 = inlined_call_operand.vmem [shape: f32[32,128], index: 14, kind: input, shape index: {}]   ;;  %s5644_s15 = inlined_call_operand.vmem [shape: f32[1,128], index: 15, kind: input, shape index: {}]   ;;  %s5645_s16 = inlined_call_operand.hbm [shape: f32[16,128], index: 16, kind: output, shape index: {}]  }
   0x1   :  { %5659 = sst [smem:[#allocation17_spill]] %s5629_s0 }
   0x2   :  { %5660 = sst [smem:[#allocation18_spill]] %s5645_s16 }
   0x3   :  { %21 = vsyncpa [#allocation4], 0 }
   0x4   :  { %22 = vsyncpa [#allocation7], 0 }
   0x5   :  { %23 = vsyncpa [#allocation10], 0 }
   0x6   :  { %24 = vsyncpa [#allocation5], 0  ;;  %s4811_s21 = smov [#allocation6]   ;;  %s4671_s25 = scalar_lea.hbm %s5632_s3, 32 }
   0x7   :  { %s46_s22 = sshll.u32 %s4811_s21, 4  ;;  %p4672_p0 = scmp.ne.s32.totalorder %s5632_s3, %s4671_s25  ;;  %s47_s22 = int_to_ptr.vmem [resolvable:$true] %s46_s22 }
   0x8   :  { %p4675_p1 = scmp.lt.u32.totalorder %s4671_s25, %s5632_s3 }
   0xa   :  { %p4677_p2 = pnand %p4675_p1, %p4672_p0 }
   0xc   :  { %4680 = shalt.err (!%p4677_p2)
}
   0xd   :  { %s4681_s30 = scalar_lea.vmem %s47_s22, 32  ;;  %p4686_p4 = scmp.lt.s32.totalorder %s47_s22, %s47_s22 }
   0xe   :  { %p4682_p3 = scmp.ne.s32.totalorder %s47_s22, %s4681_s30  ;;  %p4687_p5 = scmp.lt.s32.totalorder %s4681_s30, %s4681_s30 }
  0x10   :  { %p4688_p6 = por %p4687_p5, %p4686_p4 }
  0x12   :  { %p4689_p7 = pnand %p4688_p6, %p4682_p3 }
  0x14   :  { %4692 = shalt.err (!%p4689_p7)
}
  0x15   :  { %s5648_s0 = smov 16   ;;  %s4813_s17 = smov 1  }
  0x16   :  { %52 = dma.hbm_to_vmem [thread:$0]  %s5632_s3, 32, %s47_s22, [#allocation7], %s5648_s0, %s5648_s0, %s4813_s17  }
  0x17   :  { %s4814_s20 = smov [#allocation9]   ;;  %s4815_s23 = smov [#allocation3]  }
  0x18   :  { %s74_s21 = sshll.u32 %s4814_s20, 4  ;;  %s30_s24 = sshll.u32 %s4815_s23, 4  ;;  %s75_s21 = int_to_ptr.vmem [resolvable:$true] %s74_s21  ;;  %s31_s24 = int_to_ptr.vmem [resolvable:$true] %s30_s24 }
  0x19   :  { %s4693_s27 = scalar_lea.hbm %s5636_s7, 32 }
  0x1a   :  { %p4694_p8 = scmp.ne.s32.totalorder %s5636_s7, %s4693_s27  ;;  %p4697_p9 = scmp.lt.u32.totalorder %s4693_s27, %s5636_s7 }
  0x1c   :  { %p4699_p10 = pnand %p4697_p9, %p4694_p8 }
  0x1e   :  { %4702 = shalt.err (!%p4699_p10)
}
  0x1f   :  { %s4703_s3 = scalar_lea.vmem %s75_s21, 32  ;;  %p4708_p12 = scmp.lt.s32.totalorder %s75_s21, %s75_s21 }
  0x20   :  { %p4704_p11 = scmp.ne.s32.totalorder %s75_s21, %s4703_s3  ;;  %p4709_p13 = scmp.lt.s32.totalorder %s4703_s3, %s4703_s3 }
  0x22   :  { %p4710_p0 = por %p4709_p13, %p4708_p12 }
  0x24   :  { %p4711_p1 = pnand %p4710_p0, %p4704_p11 }
  0x26   :  { %4714 = shalt.err (!%p4711_p1)
}
  0x27   :  { %80 = dma.hbm_to_vmem [thread:$0]  %s5636_s7, 32, %s75_s21, [#allocation10], %s5648_s0, %s5648_s0, %s4813_s17  }
  0x28   :  { %s5661_s20 = sld [smem:[#allocation17_spill]] }
  0x2e   :  { %s4715_s23 = scalar_lea.hbm %s5661_s20, 256 }
  0x2f   :  { %p4716_p2 = scmp.ne.s32.totalorder %s5661_s20, %s4715_s23  ;;  %p4719_p3 = scmp.lt.u32.totalorder %s4715_s23, %s5661_s20 }
  0x31   :  { %p4721_p4 = pnand %p4719_p3, %p4716_p2 }
  0x33   :  { %4724 = shalt.err (!%p4721_p4)
}
  0x34   :  { %s4725_s29 = scalar_lea.vmem %s31_s24, 256  ;;  %p4730_p6 = scmp.lt.s32.totalorder %s31_s24, %s31_s24 }
  0x35   :  { %p4726_p5 = scmp.ne.s32.totalorder %s31_s24, %s4725_s29  ;;  %p4731_p7 = scmp.lt.s32.totalorder %s4725_s29, %s4725_s29 }
  0x37   :  { %p4732_p8 = por %p4731_p7, %p4730_p6 }
  0x39   :  { %p4733_p9 = pnand %p4732_p8, %p4726_p5 }
  0x3b   :  { %4736 = shalt.err (!%p4733_p9)
}
  0x3c   :  { %s5650_s7 = smov 128   ;;  %s5657_s21 = smov 8  }
  0x3d   :  { %36 = dma.hbm_to_vmem [thread:$0]  %s5661_s20, 256, %s31_s24, [#allocation4], %s5650_s7, %s5650_s7, %s5657_s21  }
  0x3e   :  { %s4818_s22 = smov [#allocation8]   ;;  %s4819_s19 = smov [#allocation11]  }
  0x3f   :  { %s60_s18 = sshll.u32 %s4818_s22, 4  ;;  %s88_s16 = sshll.u32 %s4819_s19, 4  ;;  %s61_s18 = int_to_ptr.vmem [resolvable:$true] %s60_s18  ;;  %s89_s16 = int_to_ptr.vmem [resolvable:$true] %s88_s16 }
  0x40   :  { %s4737_s26 = scalar_lea.hbm %s5634_s5, 32 }
  0x41   :  { %p4738_p10 = scmp.ne.s32.totalorder %s5634_s5, %s4737_s26  ;;  %p4741_p11 = scmp.lt.u32.totalorder %s4737_s26, %s5634_s5 }
  0x43   :  { %p4743_p12 = pnand %p4741_p11, %p4738_p10 }
  0x45   :  { %4746 = shalt.err (!%p4743_p12)
}
  0x46   :  { %s4747_s24 = scalar_lea.vmem %s61_s18, 32  ;;  %p4752_p0 = scmp.lt.s32.totalorder %s61_s18, %s61_s18 }
  0x47   :  { %p4748_p13 = scmp.ne.s32.totalorder %s61_s18, %s4747_s24  ;;  %p4753_p1 = scmp.lt.s32.totalorder %s4747_s24, %s4747_s24 }
  0x49   :  { %p4754_p2 = por %p4753_p1, %p4752_p0 }
  0x4b   :  { %p4755_p3 = pnand %p4754_p2, %p4748_p13 }
  0x4d   :  { %4758 = shalt.err (!%p4755_p3)
}
  0x4e   :  { %s5662_s20 = smov 16   ;;  %s4759_s19 = scalar_lea.hbm %s5638_s9, 32 }
  0x4f   :  { %66 = dma.hbm_to_vmem [thread:$0]  %s5634_s5, 32, %s61_s18, [#allocation7], %s5662_s20, %s5662_s20, %s4813_s17  }
  0x50   :  { %p4760_p4 = scmp.ne.s32.totalorder %s5638_s9, %s4759_s19  ;;  %p4763_p5 = scmp.lt.u32.totalorder %s4759_s19, %s5638_s9 }
  0x52   :  { %p4765_p6 = pnand %p4763_p5, %p4760_p4 }
  0x54   :  { %4768 = shalt.err (!%p4765_p6)
}
  0x55   :  { %s4769_s28 = scalar_lea.vmem %s89_s16, 32  ;;  %p4774_p8 = scmp.lt.s32.totalorder %s89_s16, %s89_s16 }
  0x56   :  { %p4770_p7 = scmp.ne.s32.totalorder %s89_s16, %s4769_s28  ;;  %p4775_p9 = scmp.lt.s32.totalorder %s4769_s28, %s4769_s28 }
  0x58   :  { %p4776_p10 = por %p4775_p9, %p4774_p8 }
  0x5a   :  { %p4777_p11 = pnand %p4776_p10, %p4770_p7 }
  0x5c   :  { %4780 = shalt.err (!%p4777_p11)
}
  0x5d   :  { %94 = dma.hbm_to_vmem [thread:$0]  %s5638_s9, 32, %s89_s16, [#allocation10], %s5662_s20, %s5662_s20, %s4813_s17  }
  0x5e   :  { %4803 = dma.done.wait [#allocation4], 256  }
  0x5f   :  { %4804 = vsyncadd [#allocation4], 4294967040 }
  0x60   :  { %4805 = dma.done.wait [#allocation7], 64  }
  0x61   :  { %4806 = vsyncadd [#allocation7], 4294967232 }
  0x62   :  { %4807 = dma.done.wait [#allocation10], 64  }
  0x63   :  { %4808 = vsyncadd [#allocation10], 4294967232  ;;  %vm140_vm0 = vcmask 261120   ;;  %v129_v0 = vld [vmem:[%s5631_s2] sm:$0xff]  ;;  %v130_v1 = vld [vmem:[%s5631_s2 + $0x8] sm:$0xff]  ;;  %v4820_v8 = vmov 0.0   ;;  %v124_v20 = vlaneseq }
  0x64   :  { %v131_v2 = vld [vmem:[%s5631_s2 + $0x10] sm:$0xff]  ;;  %v4477_v3 = vpack.c.bf16 %v130_v1, %v129_v0  ;;  %v132_v4 = vld [vmem:[%s5631_s2 + $0x18] sm:$0xff]  ;;  %4213 = vmatprep.subr.mxu1 %v4820_v8  ;;  %vm4821_vm1 = vmmov 0   ;;  %v3969_v9 = vld [vmem:[#allocation6] ss:$0 sm:$0xff]  ;;  %s4822_s16 = smov 64  }
  0x65   :  { %v5009_v5 = vld [vmem:[#allocation3] sm:$0xff]  ;;  %v4481_v6 = vpack.c.bf16 %v132_v4, %v131_v2  ;;  %v5013_v7 = vld [vmem:[#allocation3 + $0x8] sm:$0xff]  ;;  %4215 = vmatprep.mubr.msk.f32.mxu1 %vm4821_vm1, %v4820_v8  ;;  %s4823_s19 = smov 96   ;;  %s4824_s23 = smov 88   ;;  %vm235_vm2 = vcmask 64512   ;;  %v5060_v22 = vshrl.u32 %v124_v20, 7 }
  0x66   :  { %4210 = vmatprep.mubr.msk.f32.mxu0 %vm140_vm0, %v5009_v5  ;;  %4478 = vmatprep.subr.bf16.mxu0 %v4477_v3  ;;  %s4825_s25 = smov 120   ;;  %s4826_s26 = smov 80   ;;  %v222_v21 = vld [vmem:[%s5630_s1] sm:$0x1]  ;;  %v4829_v24 = vmov 0   ;;  %v5066_v26 = vand.u32 127, %v124_v20 }
  0x67   :  { %4480 = vmatpush3.bf16.msra.mxu0 %v4477_v3  ;;  %s4827_s27 = smov 112   ;;  %s4828_s28 = smov 104   ;;  %vm223_vm3 = vcmp.gt.f32.partialorder %v222_v21, 0.5  ;;  %v5063_v23 = vsub.s32 0, %v5060_v22  ;;  %v4830_v29 = vmov -1e+09  }
  0x68   :  { %4482 = vmatprep.subr.bf16.mxu0 %v4481_v6  ;;  %v224_v25 = vsel %vm223_vm3, 1, %v4829_v24  ;;  %vm128_vm4 = vcmp.ge.s32.totalorder %v5060_v22, %v5066_v26  ;;  %s4831_s29 = smov 72   ;;  %v919_v62 = vld [vmem:[%s5630_s1 + $0x1] sm:$0x1]  ;;  %s5651_s3 = smov 48   ;;  %vm571_vm10 = vcmask 130112  }
  0x69   :  { %v228_v27 = vrot.slane %v224_v25, %v5063_v23  ;;  %vm920_vm7 = vcmp.gt.f32.partialorder %v919_v62, 0.5  ;;  %s4833_s22 = smov 56   ;;  %s5653_s0 = smov 40   ;;  %vm744_vm11 = vcmask 195712   ;;  %vm917_vm12 = vcmask 261312  }
  0x6a   :  { %v921_v63 = vsel %vm920_vm7, 1, %v4829_v24  ;;  %s5655_s9 = smov 24   ;;  %vm1862_vm13 = vcmask 523264  }
  0x6b   :  { %4484 = vmatpush3.bf16.msra.mxu0 %v4481_v6  ;;  %vm229_vm5 = vcmp.eq.s32.totalorder %v228_v27, 1  ;;  %v925_v0 = vrot.slane %v921_v63, %v5063_v23 }
  0x6c   :  { %4233 = vmatprep.subr.mxu0 %v4820_v8  ;;  %vm230_vm6 = vmand %vm128_vm4, %vm229_vm5 }
  0x6d   :  { %v5075_v30 = vsel %vm230_vm6, 0.0, %v4830_v29  ;;  %vm926_vm8 = vcmp.eq.s32.totalorder %v925_v0, 1 }
  0x6e   :  { %4211 = vmatmul.mubr.msk.f32.vlgmr.msra.gmra.mrb[0].mxu0 %vm140_vm0, %v5013_v7  ;;  %vm927_vm9 = vmand %vm128_vm4, %vm926_vm8 }
  0x6f   :  { %4235 = vmatprep.mubr.msk.f32.mxu0 %vm4821_vm1, %v4820_v8 }
 0x141   :  { %v4212_v10 = vpop.f32.mrb[0].mxu0 }
 0x142   :  { %v5023_v11 = vadd.f32 %v4212_v10, %v3969_v9  ;;  %v213_v12 = vpop.f32.mrb[1].mxu0 }
 0x143   :  { %v5025_v13 = vadd.f32 %v3969_v9, %v213_v12 }
 0x145   :  { %323 = vrot.lane.b32.xlu1 %v5025_v13, %s4822_s16  ;;  %233 = vrot.lane.b32.xlu0 %v5025_v13, %s4823_s19 }
 0x149   :  { %402 = vrot.lane.b32.xlu1 %v5025_v13, %s4824_s23 }
 0x14d   :  { %400 = vrot.lane.b32.xlu1 %v5025_v13, %s4825_s25 }
 0x151   :  { %575 = vrot.lane.b32.xlu1 %v5025_v13, %s4826_s26 }
 0x155   :  { %573 = vrot.lane.b32.xlu1 %v5025_v13, %s4827_s27 }
 0x159   :  { %746 = vrot.lane.b32.xlu1 %v5025_v13, %s4828_s28 }
 0x1b7   :  { %v324_v14 = vpop.permute.xlu1 %323  ;;  %v234_v15 = vpop.permute.xlu0 %233 }
 0x1b8   :  { %4214 = vmatpush3.xpose.msk.msra.mxu1 %vm235_vm2, %v234_v15 }
 0x1b9   :  { %4218 = vmatprep.subr.mxu1 %v4820_v8 }
 0x1bb   :  { %v5043_v16 = vpop.permute.xlu1 %402  ;;  %4216 = vmatmul.mubr.msk.f32.vlgmr.msra.gmra.mrb[0].mxu1 %vm235_vm2, %v5025_v13 }
 0x1bc   :  { %4219 = vmatpush3.msra.mxu1 %v324_v14  ;;  %4220 = vmatprep.mubr.msk.f32.mxu1 %vm4821_vm1, %v4820_v8 }
 0x1bd   :  { %4223 = vmatprep.subr.mxu1 %v4820_v8 }
 0x1bf   :  { %v5050_v17 = vpop.permute.xlu1 %400 }
 0x1c3   :  { %v576_v18 = vpop.permute.xlu1 %575 }
 0x1c4   :  { %4234 = vmatpush3.xpose.msk.msra.mxu0 %vm235_vm2, %v576_v18 }
 0x1c5   :  { %4243 = vmatprep.subr.mxu0 %v4820_v8 }
 0x1c7   :  { %v574_v19 = vpop.permute.xlu1 %573 }
 0x1c8   :  { %4236 = vmatmul.mubr.msk.f32.vlgmr.msra.gmra.mrb[2].mxu0 %vm235_vm2, %v574_v19 }
 0x1c9   :  { %4245 = vmatprep.mubr.msk.f32.mxu0 %vm4821_vm1, %v4820_v8 }
 0x1cb   :  { %v747_v44 = vpop.permute.xlu1 %746 }
 0x28e   :  { %v306_v28 = vpop.f32.mrb[0].mxu1 }
 0x28f   :  { %v310_v31 = vmul.f32 0.35355338, %v306_v28  ;;  %v4217_v32 = vpop.f32.mrb[1].mxu1 }
 0x291   :  { %v311_v33 = vadd.f32 %v310_v31, %v5075_v30 }
 0x293   :  { %v312_v34 = vsel %vm235_vm2, %v311_v33, -inf }
 0x294   :  { %313 = vmax.xlane.f32.xlu0 %v312_v34 }
 0x29b   :  { %v647_v35 = vpop.f32.mrb[2].mxu0 }
 0x29c   :  { %v4237_v36 = vpop.f32.mrb[3].mxu0  ;;  %v651_v37 = vmul.f32 0.35355338, %v647_v35 }
 0x29e   :  { %v5086_v38 = vadd.f32 %v651_v37, %v5075_v30 }
 0x2a0   :  { %v653_v39 = vsel %vm235_vm2, %v5086_v38, -inf }
 0x2aa   :  { %748 = vrot.lane.b32.xlu0 %v5025_v13, %s4831_s29 }
 0x2ae   :  { %1268 = vrot.lane.b32.xlu0 %v5023_v11, %s4827_s27 }
 0x2b2   :  { %1440 = vrot.lane.b32.xlu0 %v5023_v11, %s4828_s28 }
 0x2d1   :  { %654 = vmax.xlane.f32.xlu0 %v653_v39 }
 0x321   :  { %v314_v40 = vpop.xlane.xlu0 %313 }
 0x322   :  { %v315_v41 = vsub.f32 %v311_v33, %v314_v40 }
 0x324   :  { %v316_v42 = vmul.f32 1.442695, %v315_v41 }
 0x325   :  { %v749_v43 = vpop.permute.xlu0 %748 }
 0x326   :  { %4591 = vpow2.f32 %v316_v42  ;;  %4244 = vmatpush3.xpose.msk.msra.mxu0 %vm235_vm2, %v749_v43 }
 0x327   :  { %4253 = vmatprep.subr.mxu0 %v4820_v8 }
 0x329   :  { %4246 = vmatmul.mubr.msk.f32.vlgmr.msra.gmra.mrb[4].mxu0 %vm235_vm2, %v747_v44  ;;  %v1269_v54 = vpop.permute.xlu0 %1268 }
 0x32a   :  { %4255 = vmatprep.mubr.msk.f32.mxu0 %vm4821_vm1, %v4820_v8 }
 0x32d   :  { %v1441_v56 = vpop.permute.xlu0 %1440 }
 0x330   :  { %v4592_v45 = vpop.eup %4591 }
 0x331   :  { %v318_v46 = vsel %vm235_vm2, %v4592_v45, 0.0 }
 0x332   :  { %319 = vadd.xlane.f32.xlu1 %v318_v46 }
 0x343   :  { %930 = vrot.lane.b32.xlu1 %v5023_v11, %s4823_s19 }
 0x347   :  { %1098 = vrot.lane.b32.xlu1 %v5023_v11, %s4824_s23 }
 0x34b   :  { %1096 = vrot.lane.b32.xlu1 %v5023_v11, %s4825_s25 }
 0x34f   :  { %1270 = vrot.lane.b32.xlu1 %v5023_v11, %s4826_s26 }
 0x353   :  { %1442 = vrot.lane.b32.xlu1 %v5023_v11, %s4831_s29 }
 0x35e   :  { %v655_v1 = vpop.xlane.xlu0 %654 }
 0x35f   :  { %v656_v6 = vsub.f32 %v5086_v38, %v655_v1 }
 0x361   :  { %v657_v18 = vmul.f32 1.442695, %v656_v6 }
 0x3bf   :  { %v320_v47 = vpop.xlane.xlu1 %319 }
 0x3c0   :  { %4593 = vrcp.f32 %v320_v47 }
 0x3c1   :  { %4595 = vpow2.f32 %v657_v18 }
 0x3c3   :  { %v931_v48 = vpop.permute.xlu1 %930 }
 0x3c4   :  { %4254 = vmatpush3.xpose.msk.msra.mxu0 %vm235_vm2, %v931_v48 }
 0x3c5   :  { %4263 = vmatprep.subr.mxu0 %v4820_v8 }
 0x3c7   :  { %v1099_v49 = vpop.permute.xlu1 %1098  ;;  %4256 = vmatmul.mubr.msk.f32.vlgmr.msra.gmra.mrb[6].mxu0 %vm235_vm2, %v5023_v11 }
 0x3c8   :  { %4264 = vmatpush3.xpose.msk.msra.mxu0 %vm235_vm2, %v1099_v49  ;;  %4265 = vmatprep.mubr.msk.f32.mxu0 %vm4821_vm1, %v4820_v8 }
 0x3c9   :  { %4273 = vmatprep.subr.mxu0 %v4820_v8 }
 0x3ca   :  { %v4594_v50 = vpop.eup %4593 }
 0x3cb   :  { %v322_v51 = vmul.f32 %v4594_v50, %v4592_v45  ;;  %v1097_v52 = vpop.permute.xlu1 %1096  ;;  %v5152_v45 = vpop.eup %4595 }
 0x3cc   :  { %4266 = vmatmul.mubr.msk.f32.vlgmr.msra.gmra.mrb[8].mxu0 %vm235_vm2, %v1097_v52  ;;  %v659_v47 = vsel %vm235_vm2, %v5152_v45, 0.0 }
 0x3cd   :  { %4221 = vmatmul.mubr.msk.f32.vlgmr.msra.gmra.mrb[2].mxu1 %vm235_vm2, %v322_v51  ;;  %4275 = vmatprep.mubr.msk.f32.mxu0 %vm4821_vm1, %v4820_v8 }
 0x3ce   :  { %4224 = vmatpush3.xpose.msk.msra.mxu1 %vm235_vm2, %v5043_v16  ;;  %4225 = vmatprep.mubr.msk.f32.mxu1 %vm4821_vm1, %v4820_v8 }
 0x3cf   :  { %v1271_v53 = vpop.permute.xlu1 %1270  ;;  %4228 = vmatprep.subr.mxu1 %v4820_v8 }
 0x3d0   :  { %4274 = vmatpush3.xpose.msk.msra.mxu0 %vm235_vm2, %v1271_v53 }
 0x3d1   :  { %4226 = vmatmul.mubr.msk.f32.vlgmr.msra.gmra.mrb[4].mxu1 %vm235_vm2, %v5050_v17  ;;  %4283 = vmatprep.subr.mxu0 %v4820_v8  ;;  %v928_v17 = vsel %vm927_vm9, 0.0, %v4830_v29 }
 0x3d2   :  { %4230 = vmatprep.mubr.msk.f32.mxu1 %vm4821_vm1, %v4820_v8 }
 0x3d3   :  { %v1443_v55 = vpop.permute.xlu1 %1442  ;;  %4276 = vmatmul.mubr.msk.f32.vlgmr.msra.gmra.mrb[10].mxu0 %vm235_vm2, %v1269_v54 }
 0x3d4   :  { %4284 = vmatpush3.xpose.msk.msra.mxu0 %vm235_vm2, %v1443_v55  ;;  %4285 = vmatprep.mubr.msk.f32.mxu0 %vm4821_vm1, %v4820_v8 }
 0x3d7   :  { %4286 = vmatmul.mubr.msk.f32.vlgmr.msra.gmra.mrb[12].mxu0 %vm235_vm2, %v1441_v56 }
 0x3fc   :  { %v820_v57 = vpop.f32.mrb[4].mxu0 }
 0x3fd   :  { %v824_v58 = vmul.f32 0.35355338, %v820_v57  ;;  %v4247_v59 = vpop.f32.mrb[5].mxu0 }
 0x3ff   :  { %v825_v60 = vadd.f32 %v824_v58, %v5075_v30 }
 0x401   :  { %v826_v61 = vsel %vm235_vm2, %v825_v60, -inf }
 0x402   :  { %827 = vmax.xlane.f32.xlu0 %v826_v61 }
 0x48f   :  { %v828_v4 = vpop.xlane.xlu0 %827 }
 0x490   :  { %v829_v10 = vsub.f32 %v825_v60, %v828_v4 }
 0x492   :  { %v830_v20 = vmul.f32 1.442695, %v829_v10 }
 0x494   :  { %4597 = vpow2.f32 %v830_v20 }
 0x49a   :  { %v1002_v2 = vpop.f32.mrb[6].mxu0 }
 0x49b   :  { %v4257_v3 = vpop.f32.mrb[7].mxu0  ;;  %v1006_v27 = vmul.f32 0.35355338, %v1002_v2 }
 0x49d   :  { %v1007_v37 = vadd.f32 %v1006_v27, %v928_v17 }
 0x49e   :  { %v5155_v46 = vpop.eup %4597 }
 0x49f   :  { %v1170_v9 = vpop.f32.mrb[8].mxu0  ;;  %v1008_v41 = vsel %vm235_vm2, %v1007_v37, -inf  ;;  %v832_v48 = vsel %vm235_vm2, %v5155_v46, 0.0 }
 0x4a0   :  { %v1174_v12 = vmul.f32 0.35355338, %v1170_v9  ;;  %v395_v14 = vpop.f32.mrb[2].mxu1  ;;  %v4267_v15 = vpop.f32.mrb[9].mxu0 }
 0x4a1   :  { %399 = vst.msk [vmem:[#allocation2] sm:$0xff] %vm235_vm2, %v395_v14  ;;  %v4222_v16 = vpop.f32.mrb[3].mxu1 }
 0x4a2   :  { %v1175_v19 = vadd.f32 %v1174_v12, %v928_v17 }
 0x4a4   :  { %v474_v21 = vpop.f32.mrb[4].mxu1  ;;  %v1176_v25 = vsel %vm235_vm2, %v1175_v19, -inf }
 0x4a5   :  { %v478_v28 = vmul.f32 0.35355338, %v474_v21  ;;  %1177 = vmax.xlane.f32.xlu0 %v1176_v25  ;;  %v4227_v31 = vpop.f32.mrb[5].mxu1 }
 0x4a6   :  { %v1342_v32 = vpop.f32.mrb[10].mxu0 }
 0x4a7   :  { %v4277_v33 = vpop.f32.mrb[11].mxu0  ;;  %v479_v34 = vadd.f32 %v478_v28, %v5075_v30  ;;  %v1346_v35 = vmul.f32 0.35355338, %v1342_v32 }
 0x4a9   :  { %v480_v36 = vsel %vm235_vm2, %v479_v34, -inf  ;;  %v1347_v43 = vadd.f32 %v1346_v35, %v928_v17 }
 0x4aa   :  { %v1514_v38 = vpop.f32.mrb[12].mxu0  ;;  %481 = vmax.xlane.f32.xlu1 %v480_v36 }
 0x4ab   :  { %v1518_v39 = vmul.f32 0.35355338, %v1514_v38  ;;  %v4287_v40 = vpop.f32.mrb[13].mxu0  ;;  %v1348_v30 = vsel %vm235_vm2, %v1347_v43, -inf }
 0x4ad   :  { %v1519_v42 = vadd.f32 %v1518_v39, %v928_v17 }
 0x4ae   :  { %1009 = vmax.xlane.f32.xlu1 %v1008_v41 }
 0x4af   :  { %v1520_v44 = vsel %vm235_vm2, %v1519_v42, -inf }
 0x4b0   :  { %1521 = vmax.xlane.f32.xlu0 %v1520_v44 }
 0x4b2   :  { %1349 = vmax.xlane.f32.xlu1 %v1348_v30 }
 0x4b4   :  { %660 = vadd.xlane.f32.xlu0 %v659_v47 }
 0x4b6   :  { %833 = vadd.xlane.f32.xlu1 %v832_v48 }
 0x532   :  { %v1178_v49 = vpop.xlane.xlu0 %1177 }
 0x533   :  { %v1179_v50 = vsub.f32 %v1175_v19, %v1178_v49 }
 0x535   :  { %v1180_v51 = vmul.f32 1.442695, %v1179_v50 }
 0x537   :  { %4599 = vpow2.f32 %v1180_v51  ;;  %v482_v52 = vpop.xlane.xlu1 %481 }
 0x538   :  { %v483_v9 = vsub.f32 %v479_v34, %v482_v52  ;;  %v1614_v52 = vld [vmem:[%s5633_s4] sm:$0xff] }
 0x53a   :  { %v484_v10 = vmul.f32 1.442695, %v483_v9 }
 0x53b   :  { %v1010_v53 = vpop.xlane.xlu1 %1009 }
 0x53c   :  { %v1011_v54 = vsub.f32 %v1007_v37, %v1010_v53  ;;  %v1615_v53 = vld [vmem:[%s5633_s4 + $0x8] sm:$0xff] }
 0x53d   :  { %v1522_v55 = vpop.xlane.xlu0 %1521 }
 0x53e   :  { %v1012_v56 = vmul.f32 1.442695, %v1011_v54  ;;  %v1523_v57 = vsub.f32 %v1519_v42, %v1522_v55  ;;  %v4485_v54 = vpack.c.bf16 %v1615_v53, %v1614_v52 }
 0x53f   :  { %v1350_v58 = vpop.xlane.xlu1 %1349 }
 0x540   :  { %4601 = vpow2.f32 %v1012_v56  ;;  %v1524_v59 = vmul.f32 1.442695, %v1523_v57  ;;  %v1351_v60 = vsub.f32 %v1347_v43, %v1350_v58  ;;  %v1616_v56 = vld [vmem:[%s5633_s4 + $0x10] sm:$0xff]  ;;  %v1617_v57 = vld [vmem:[%s5633_s4 + $0x18] sm:$0xff]  ;;  %4486 = vmatprep.subr.bf16.mxu0 %v4485_v54 }
 0x541   :  { %v5161_v61 = vpop.eup %4599  ;;  %v661_v15 = vpop.xlane.xlu0 %660  ;;  %4488 = vmatpush3.bf16.msra.mxu0 %v4485_v54 }
 0x542   :  { %4603 = vpow2.f32 %v1524_v59  ;;  %v1352_v62 = vmul.f32 1.442695, %v1351_v60  ;;  %v1182_v63 = vsel %vm235_vm2, %v5161_v61, 0.0  ;;  %v4489_v59 = vpack.c.bf16 %v1617_v57, %v1616_v56  ;;  %v3999_v57 = vld [vmem:[%s5639_s10] ss:$0 sm:$0xff] }
 0x543   :  { %1183 = vadd.xlane.f32.xlu1 %v1182_v63  ;;  %v834_v19 = vpop.xlane.xlu1 %833 }
 0x544   :  { %4605 = vpow2.f32 %v1352_v62  ;;  %4490 = vmatprep.subr.bf16.mxu0 %v4489_v59 }
 0x545   :  { %4607 = vpow2.f32 %v484_v10  ;;  %4492 = vmatpush3.bf16.msra.mxu0 %v4489_v59  ;;  %v4000_v59 = vld [vmem:[%s5640_s11] ss:$0 sm:$0xff] }
 0x54a   :  { %v5165_v0 = vpop.eup %4601 }
 0x54b   :  { %v1014_v1 = vsel %vm235_vm2, %v5165_v0, 0.0 }
 0x54c   :  { %v5169_v2 = vpop.eup %4603  ;;  %1015 = vadd.xlane.f32.xlu0 %v1014_v1 }
 0x54d   :  { %v1526_v3 = vsel %vm235_vm2, %v5169_v2, 0.0 }
 0x54e   :  { %v5173_v4 = vpop.eup %4605  ;;  %1527 = vadd.xlane.f32.xlu1 %v1526_v3 }
 0x54f   :  { %v1354_v6 = vsel %vm235_vm2, %v5173_v4, 0.0  ;;  %v4608_v12 = vpop.eup %4607 }
 0x550   :  { %1355 = vadd.xlane.f32.xlu0 %v1354_v6  ;;  %v486_v14 = vsel %vm235_vm2, %v4608_v12, 0.0 }
 0x55f   :  { %664 = vrot.lane.b32.xlu1 %v5025_v13, %s5651_s3 }
 0x566   :  { %491 = vrot.lane.b32.xlu0 %v5025_v13, %s4833_s22 }
 0x56a   :  { %1019 = vrot.lane.b32.xlu0 %v5023_v11, %s4822_s16 }
 0x56e   :  { %1359 = vrot.lane.b32.xlu0 %v5023_v11, %s5651_s3 }
 0x583   :  { %487 = vadd.xlane.f32.xlu1 %v486_v14 }
 0x594   :  { %837 = vrot.lane.b32.xlu1 %v5025_v13, %s5653_s0 }
 0x598   :  { %1187 = vrot.lane.b32.xlu1 %v5023_v11, %s4833_s22 }
 0x59c   :  { %1531 = vrot.lane.b32.xlu1 %v5023_v11, %s5653_s0 }
 0x5d0   :  { %v1184_v20 = vpop.xlane.xlu1 %1183 }
 0x5d9   :  { %v1016_v16 = vpop.xlane.xlu0 %1015 }
 0x5db   :  { %v1528_v21 = vpop.xlane.xlu1 %1527 }
 0x5dd   :  { %v1356_v17 = vpop.xlane.xlu0 %1355 }
 0x5df   :  { %v665_v25 = vpop.permute.xlu1 %664 }
 0x5e1   :  { %v492_v18 = vpop.permute.xlu0 %491 }
 0x5e2   :  { %4229 = vmatpush3.msra.mxu1 %v492_v18 }
 0x5e3   :  { %4238 = vmatprep.subr.mxu1 %v4820_v8 }
 0x5e5   :  { %v1020_v36 = vpop.permute.xlu0 %1019 }
 0x5e9   :  { %v1360_v42 = vpop.permute.xlu0 %1359 }
 0x610   :  { %v488_v27 = vpop.xlane.xlu1 %487 }
 0x611   :  { %4609 = vrcp.f32 %v488_v27 }
 0x612   :  { %4611 = vrcp.f32 %v661_v15  ;;  %v3996_v15 = vld [vmem:[#allocation8] ss:$0 sm:$0xff] }
 0x613   :  { %4613 = vrcp.f32 %v834_v19 }
 0x614   :  { %4615 = vrcp.f32 %v1016_v16  ;;  %v838_v33 = vpop.permute.xlu1 %837 }
 0x615   :  { %4617 = vrcp.f32 %v1184_v20 }
 0x616   :  { %4619 = vrcp.f32 %v1356_v17 }
 0x617   :  { %4621 = vrcp.f32 %v1528_v21 }
 0x618   :  { %v1188_v39 = vpop.permute.xlu1 %1187 }
 0x61b   :  { %v4610_v13 = vpop.eup %4609 }
 0x61c   :  { %v490_v28 = vmul.f32 %v4610_v13, %v4608_v12  ;;  %v4612_v31 = vpop.eup %4611 }
 0x61d   :  { %v663_v11 = vmul.f32 %v4612_v31, %v5152_v45  ;;  %v4614_v32 = vpop.eup %4613  ;;  %v1532_v45 = vpop.permute.xlu1 %1531 }
 0x61e   :  { %4231 = vmatmul.mubr.msk.f32.vlgmr.msra.gmra.mrb[6].mxu1 %vm235_vm2, %v490_v28  ;;  %v836_v34 = vmul.f32 %v4614_v32, %v5155_v46  ;;  %v4616_v35 = vpop.eup %4615 }
 0x61f   :  { %4239 = vmatpush3.msra.mxu1 %v665_v25  ;;  %4240 = vmatprep.mubr.msk.f32.mxu1 %vm4821_vm1, %v4820_v8  ;;  %v1018_v37 = vmul.f32 %v4616_v35, %v5165_v0  ;;  %v4618_v38 = vpop.eup %4617 }
 0x620   :  { %4248 = vmatprep.subr.mxu1 %v4820_v8  ;;  %v1186_v40 = vmul.f32 %v4618_v38, %v5161_v61  ;;  %v4620_v41 = vpop.eup %4619 }
 0x621   :  { %v1358_v43 = vmul.f32 %v4620_v41, %v5173_v4  ;;  %v4622_v44 = vpop.eup %4621 }
 0x622   :  { %4241 = vmatmul.mubr.msk.f32.vlgmr.msra.gmra.mrb[8].mxu1 %vm235_vm2, %v663_v11  ;;  %v1530_v30 = vmul.f32 %v4622_v44, %v5169_v2  ;;  %v1849_v44 = vld [vmem:[%s5637_s8 + $0x10] sm:$0xff] }
 0x623   :  { %4249 = vmatpush3.msra.mxu1 %v838_v33  ;;  %4250 = vmatprep.mubr.msk.f32.mxu1 %vm4821_vm1, %v4820_v8 }
 0x624   :  { %4258 = vmatprep.subr.mxu1 %v4820_v8 }
 0x626   :  { %4251 = vmatmul.mubr.msk.f32.vlgmr.msra.gmra.mrb[10].mxu1 %vm235_vm2, %v836_v34 }
 0x627   :  { %4259 = vmatpush3.msra.mxu1 %v1020_v36  ;;  %4260 = vmatprep.mubr.msk.f32.mxu1 %vm4821_vm1, %v4820_v8 }
 0x628   :  { %4268 = vmatprep.subr.mxu1 %v4820_v8 }
 0x62a   :  { %4261 = vmatmul.mubr.msk.f32.vlgmr.msra.gmra.mrb[12].mxu1 %vm235_vm2, %v1018_v37  ;;  %v1754_v37 = vld [vmem:[%s5635_s6 + $0x8] sm:$0xff] }
 0x62b   :  { %4269 = vmatpush3.msra.mxu1 %v1188_v39  ;;  %4270 = vmatprep.mubr.msk.f32.mxu1 %vm4821_vm1, %v4820_v8  ;;  %v1755_v39 = vld [vmem:[%s5635_s6 + $0x10] sm:$0xff] }
 0x62c   :  { %4278 = vmatprep.subr.mxu1 %v4820_v8 }
 0x62e   :  { %4271 = vmatmul.mubr.msk.f32.vlgmr.msra.gmra.mrb[14].mxu1 %vm235_vm2, %v1186_v40  ;;  %v1756_v40 = vld [vmem:[%s5635_s6 + $0x18] sm:$0xff] }
 0x62f   :  { %4279 = vmatpush3.msra.mxu1 %v1360_v42  ;;  %4280 = vmatprep.mubr.msk.f32.mxu1 %vm4821_vm1, %v4820_v8  ;;  %v4497_v41 = vpack.c.bf16 %v1756_v40, %v1755_v39  ;;  %v1847_v42 = vld [vmem:[%s5637_s8] sm:$0xff]  ;;  %v4010_v39 = vld [vmem:[%s5631_s2 + $0x28] sm:$0xff] }
 0x630   :  { %4288 = vmatprep.subr.mxu1 %v4820_v8 }
 0x632   :  { %4281 = vmatmul.mubr.msk.f32.vlgmr.msra.gmra.mrb[16].mxu1 %vm235_vm2, %v1358_v43  ;;  %v1848_v43 = vld [vmem:[%s5637_s8 + $0x8] sm:$0xff] }
 0x633   :  { %4289 = vmatpush3.msra.mxu1 %v1532_v45  ;;  %4290 = vmatprep.mubr.msk.f32.mxu1 %vm4821_vm1, %v4820_v8  ;;  %v4501_v45 = vpack.c.bf16 %v1848_v43, %v1847_v42  ;;  %v4012_v42 = vld [vmem:[%s5631_s2 + $0x38] sm:$0xff] }
 0x635   :  { %4502 = vmatprep.subr.bf16.mxu0 %v4501_v45 }
 0x636   :  { %4291 = vmatmul.mubr.msk.f32.vlgmr.msra.gmra.mrb[18].mxu1 %vm235_vm2, %v1530_v30  ;;  %v1850_v30 = vld [vmem:[%s5637_s8 + $0x18] sm:$0xff] }
 0x6f1   :  { %v563_v46 = vpop.f32.mrb[6].mxu1 }
 0x6f2   :  { %568 = vrot.lane.b32.xlu0 %v563_v46, %s5657_s21  ;;  %v4232_v47 = vpop.f32.mrb[7].mxu1  ;;  %v4505_v46 = vpack.c.bf16 %v1850_v30, %v1849_v44 }
 0x6f3   :  { %v1851_v47 = vld [vmem:[%s5637_s8 + $0x20] sm:$0xff] }
 0x6f5   :  { %v736_v48 = vpop.f32.mrb[8].mxu1 }
 0x6f6   :  { %741 = vrot.lane.b32.xlu1 %v736_v48, %s5662_s20  ;;  %v4242_v49 = vpop.f32.mrb[9].mxu1  ;;  %v1852_v48 = vld [vmem:[%s5637_s8 + $0x28] sm:$0xff] }
 0x6f7   :  { %v4509_v49 = vpack.c.bf16 %v1852_v48, %v1851_v47 }
 0x6f9   :  { %v909_v50 = vpop.f32.mrb[10].mxu1 }
 0x6fa   :  { %914 = vrot.lane.b32.xlu1 %v909_v50, %s5655_s9  ;;  %v4252_v51 = vpop.f32.mrb[11].mxu1 }
 0x6fd   :  { %v1091_v55 = vpop.f32.mrb[12].mxu1 }
 0x6fe   :  { %1095 = vst.msk [vmem:[#allocation2 + $0x8] sm:$0xff] %vm235_vm2, %v1091_v55  ;;  %v4262_v58 = vpop.f32.mrb[13].mxu1 }
 0x701   :  { %v1259_v60 = vpop.f32.mrb[14].mxu1 }
 0x702   :  { %1264 = vrot.lane.b32.xlu0 %v1259_v60, %s5657_s21  ;;  %v4272_v61 = vpop.f32.mrb[15].mxu1 }
 0x705   :  { %v1431_v62 = vpop.f32.mrb[16].mxu1 }
 0x706   :  { %1436 = vrot.lane.b32.xlu0 %v1431_v62, %s5662_s20  ;;  %v4282_v63 = vpop.f32.mrb[17].mxu1 }
 0x709   :  { %v1603_v0 = vpop.f32.mrb[18].mxu1 }
 0x70a   :  { %1608 = vrot.lane.b32.xlu1 %v1603_v0, %s5655_s9  ;;  %v4292_v1 = vpop.f32.mrb[19].mxu1 }
 0x764   :  { %v569_v2 = vpop.permute.xlu0 %568 }
 0x765   :  { %572 = vst.msk [vmem:[#allocation2] sm:$0xff] %vm571_vm10, %v569_v2  ;;  %v1853_v2 = vld [vmem:[%s5637_s8 + $0x30] sm:$0xff] }
 0x768   :  { %v742_v3 = vpop.permute.xlu1 %741 }
 0x769   :  { %745 = vst.msk [vmem:[#allocation2] sm:$0xff] %vm744_vm11, %v742_v3  ;;  %v1854_v3 = vld [vmem:[%s5637_s8 + $0x38] sm:$0xff] }
 0x76c   :  { %v915_v4 = vpop.permute.xlu1 %914 }
 0x76d   :  { %918 = vst.msk [vmem:[#allocation2] sm:$0xff] %vm917_vm12, %v915_v4  ;;  %v4513_v4 = vpack.c.bf16 %v1854_v3, %v1853_v2 }
 0x774   :  { %v1265_v6 = vpop.permute.xlu0 %1264  ;;  %v1612_v9 = vld [vmem:[#allocation2] sm:$0xff] }
 0x775   :  { %1267 = vst.msk [vmem:[#allocation2 + $0x8] sm:$0xff] %vm571_vm10, %v1265_v6  ;;  %4301 = vmatprep.mubr.msk.f32.mxu0 %vm140_vm0, %v1612_v9  ;;  %v4001_v6 = vld [vmem:[#allocation9] ss:$0 sm:$0xff] }
 0x778   :  { %v1437_v10 = vpop.permute.xlu0 %1436 }
 0x779   :  { %1439 = vst.msk [vmem:[#allocation2 + $0x8] sm:$0xff] %vm744_vm11, %v1437_v10 }
 0x77c   :  { %v1609_v12 = vpop.permute.xlu1 %1608 }
 0x77d   :  { %1611 = vst.msk [vmem:[#allocation2 + $0x8] sm:$0xff] %vm917_vm12, %v1609_v12 }
 0x784   :  { %v1613_v14 = vld [vmem:[#allocation2 + $0x8] sm:$0xff] }
 0x785   :  { %4302 = vmatmul.mubr.msk.f32.vlgmr.msra.gmra.mrb[14].mxu0 %vm140_vm0, %v1613_v14 }
 0x786   :  { %4504 = vmatpush3.bf16.msra.mxu0 %v4501_v45 }
 0x787   :  { %4506 = vmatprep.subr.bf16.mxu0 %v4505_v46 }
 0x78a   :  { %4508 = vmatpush3.bf16.msra.mxu0 %v4505_v46 }
 0x78b   :  { %4510 = vmatprep.subr.bf16.mxu0 %v4509_v49 }
 0x78e   :  { %4512 = vmatpush3.bf16.msra.mxu0 %v4509_v49 }
 0x78f   :  { %4514 = vmatprep.subr.bf16.mxu0 %v4513_v4 }
 0x792   :  { %4516 = vmatpush3.bf16.msra.mxu0 %v4513_v4 }
 0x793   :  { %4355 = vmatprep.subr.mxu0 %v4820_v8 }
 0x858   :  { %v4303_v16 = vpop.f32.mrb[14].mxu0 }
 0x859   :  { %v1703_v17 = vadd.f32 %v4303_v16, %v3996_v15  ;;  %v1697_v18 = vpop.f32.mrb[15].mxu0 }
 0x85a   :  { %v1698_v19 = vadd.f32 %v3996_v15, %v1697_v18 }
 0x85b   :  { %v1707_v20 = vadd.f32 %v1703_v17, %v5013_v7  ;;  %v4004_v17 = vld [vmem:[#allocation11] ss:$0 sm:$0xff] }
 0x85c   :  { %v1706_v21 = vadd.f32 %v1698_v19, %v5009_v5  ;;  %v1753_v5 = vld [vmem:[%s5635_s6] sm:$0xff] }
 0x85d   :  { %v1713_v25 = vsel %vm140_vm0, %v1707_v20, 0.0  ;;  %v4493_v38 = vpack.c.bf16 %v1754_v37, %v1753_v5 }
 0x85e   :  { %1714 = vadd.xlane.f32.xlu1 %v1713_v25  ;;  %v1710_v27 = vsel %vm140_vm0, %v1706_v21, 0.0 }
 0x85f   :  { %1711 = vadd.xlane.f32.xlu0 %v1710_v27  ;;  %4494 = vmatprep.subr.bf16.mxu1 %v4493_v38 }
 0x860   :  { %4496 = vmatpush3.bf16.msra.mxu1 %v4493_v38  ;;  %v4009_v38 = vld [vmem:[%s5631_s2 + $0x20] sm:$0xff] }
 0x861   :  { %4498 = vmatprep.subr.bf16.mxu1 %v4497_v41  ;;  %v4517_v40 = vpack.c.bf16 %v4010_v39, %v4009_v38 }
 0x864   :  { %4500 = vmatpush3.bf16.msra.mxu1 %v4497_v41  ;;  %v4011_v41 = vld [vmem:[%s5631_s2 + $0x30] sm:$0xff] }
 0x865   :  { %4518 = vmatprep.subr.bf16.mxu1 %v4517_v40  ;;  %v4521_v43 = vpack.c.bf16 %v4012_v42, %v4011_v41 }
 0x8eb   :  { %v1715_v13 = vpop.xlane.xlu1 %1714 }
 0x8ec   :  { %v1718_v28 = vmul.f32 0.03125, %v1715_v13  ;;  %v1712_v31 = vpop.xlane.xlu0 %1711 }
 0x8ed   :  { %v1717_v11 = vmul.f32 0.03125, %v1712_v31 }
 0x8ee   :  { %v1720_v32 = vsub.f32 %v1707_v20, %v1718_v28 }
 0x8ef   :  { %v1719_v33 = vsub.f32 %v1706_v21, %v1717_v11 }
 0x8f0   :  { %v1722_v36 = vmul.f32 %v1720_v32, %v1720_v32 }
 0x8f1   :  { %v1721_v34 = vmul.f32 %v1719_v33, %v1719_v33 }
 0x8f2   :  { %v1726_v7 = vsel %vm140_vm0, %v1722_v36, 0.0 }
 0x8f3   :  { %v1723_v35 = vsel %vm140_vm0, %v1721_v34, 0.0 }
 0x8f4   :  { %1724 = vadd.xlane.f32.xlu0 %v1723_v35 }
 0x8f8   :  { %1727 = vadd.xlane.f32.xlu0 %v1726_v7 }
 0x981   :  { %v1725_v50 = vpop.xlane.xlu0 %1724 }
 0x982   :  { %v1729_v51 = vmul.f32 0.03125, %v1725_v50  ;;  %v4007_v50 = vld [vmem:[%s5641_s12] ss:$0 sm:$0xff] }
 0x984   :  { %v1731_v52 = vadd.f32 1e-05, %v1729_v51 }
 0x985   :  { %v1728_v53 = vpop.xlane.xlu0 %1727 }
 0x986   :  { %4623 = vrsqrt.f32 %v1731_v52  ;;  %v1730_v54 = vmul.f32 0.03125, %v1728_v53 }
 0x988   :  { %v1732_v55 = vadd.f32 1e-05, %v1730_v54  ;;  %v4008_v54 = vld [vmem:[%s5642_s13] ss:$0 sm:$0xff] }
 0x98a   :  { %4625 = vrsqrt.f32 %v1732_v55 }
 0x990   :  { %v4624_v56 = vpop.eup %4623 }
 0x991   :  { %v1735_v58 = vmul.f32 %v4624_v56, %v1719_v33 }
 0x993   :  { %v1743_v60 = vmul.f32 %v3999_v57, %v1735_v58 }
 0x994   :  { %v4626_v61 = vpop.eup %4625 }
 0x995   :  { %v1736_v62 = vmul.f32 %v4626_v61, %v1720_v32  ;;  %v1751_v63 = vadd.f32 %v4000_v59, %v1743_v60 }
 0x997   :  { %v1744_v0 = vmul.f32 %v3999_v57, %v1736_v62  ;;  %4312 = vmatprep.mubr.msk.f32.mxu1 %vm140_vm0, %v1751_v63 }
 0x999   :  { %v1752_v1 = vadd.f32 %v4000_v59, %v1744_v0  ;;  %v4013_v59 = vld [vmem:[#allocation6 + $0x1] ss:$0 sm:$0xff] }
 0x99b   :  { %4313 = vmatmul.mubr.msk.f32.vlgmr.msra.gmra.mrb[20].mxu1 %vm140_vm0, %v1752_v1 }
 0x99c   :  { %4520 = vmatpush3.bf16.msra.mxu1 %v4517_v40 }
 0x99d   :  { %4522 = vmatprep.subr.bf16.mxu1 %v4521_v43 }
 0x9a0   :  { %4524 = vmatpush3.bf16.msra.mxu1 %v4521_v43 }
 0x9a1   :  { %4345 = vmatprep.subr.mxu1 %v4820_v8 }
 0xa6e   :  { %v4314_v9 = vpop.f32.mrb[20].mxu1 }
 0xa6f   :  { %v1842_v10 = vadd.f32 %v4314_v9, %v4001_v6  ;;  %v1836_v12 = vpop.f32.mrb[21].mxu1 }
 0xa70   :  { %v1837_v14 = vadd.f32 %v4001_v6, %v1836_v12 }
 0xa71   :  { %v1846_v16 = vmax.f32 %v1842_v10, 0.0 }
 0xa72   :  { %v1845_v15 = vmax.f32 %v1837_v14, 0.0 }
 0xa74   :  { %4331 = vmatprep.mubr.msk.f32.mxu0 %vm1862_vm13, %v1845_v15 }
 0xa75   :  { %4332 = vmatmul.mubr.msk.f32.vlgmr.msra.gmra.mrb[16].mxu0 %vm1862_vm13, %v1846_v16 }
 0xa76   :  { %4357 = vmatprep.mubr.msk.f32.mxu0 %vm4821_vm1, %v4820_v8 }
 0xb48   :  { %v4333_v18 = vpop.f32.mrb[16].mxu0 }
 0xb49   :  { %v1941_v19 = vadd.f32 %v4333_v18, %v4004_v17  ;;  %v1935_v20 = vpop.f32.mrb[17].mxu0 }
 0xb4a   :  { %v1936_v21 = vadd.f32 %v4004_v17, %v1935_v20  ;;  %v2084_v20 = vld [vmem:[%s5630_s1] sm:$0x1] }
 0xb4b   :  { %v1945_v25 = vadd.f32 %v1941_v19, %v1752_v1  ;;  %vm2085_vm14 = vcmp.gt.f32.partialorder %v2084_v20, 0.5 }
 0xb4c   :  { %v1944_v27 = vadd.f32 %v1936_v21, %v1751_v63  ;;  %v2086_v21 = vsel %vm2085_vm14, 1, %v4829_v24 }
 0xb4d   :  { %v1951_v13 = vsel %vm140_vm0, %v1945_v25, 0.0 }
 0xb4e   :  { %1952 = vadd.xlane.f32.xlu0 %v1951_v13  ;;  %v1948_v28 = vsel %vm140_vm0, %v1944_v27, 0.0 }
 0xb4f   :  { %1949 = vadd.xlane.f32.xlu1 %v1948_v28 }
 0xbdb   :  { %v1953_v31 = vpop.xlane.xlu0 %1952 }
 0xbdc   :  { %v1955_v11 = vmul.f32 0.03125, %v1953_v31  ;;  %v1950_v32 = vpop.xlane.xlu1 %1949 }
 0xbdd   :  { %v1954_v33 = vmul.f32 0.03125, %v1950_v32 }
 0xbde   :  { %v1957_v34 = vsub.f32 %v1945_v25, %v1955_v11  ;;  %v2090_v25 = vrot.slane %v2086_v21, %v5063_v23 }
 0xbdf   :  { %v1956_v35 = vsub.f32 %v1944_v27, %v1954_v33  ;;  %v2777_v27 = vld [vmem:[%s5630_s1 + $0x1] sm:$0x1]  ;;  %s5663_s1 = smov 40  }
 0xbe0   :  { %v1959_v36 = vmul.f32 %v1957_v34, %v1957_v34  ;;  %vm2091_vm15 = vcmp.eq.s32.totalorder %v2090_v25, 1  ;;  %vm2778_vm5 = vcmp.gt.f32.partialorder %v2777_v27, 0.5 }
 0xbe1   :  { %v1958_v7 = vmul.f32 %v1956_v35, %v1956_v35  ;;  %vm2092_vm3 = vmand %vm128_vm4, %vm2091_vm15 }
 0xbe2   :  { %v1963_v5 = vsel %vm140_vm0, %v1959_v36, 0.0  ;;  %v2093_v28 = vsel %vm2092_vm3, 0.0, %v4830_v29  ;;  %v2779_v36 = vsel %vm2778_vm5, 1, %v4829_v24 }
 0xbe3   :  { %1964 = vadd.xlane.f32.xlu0 %v1963_v5  ;;  %v1960_v37 = vsel %vm140_vm0, %v1958_v7, 0.0  ;;  %v2783_v38 = vrot.slane %v2779_v36, %v5063_v23 }
 0xbe4   :  { %1961 = vadd.xlane.f32.xlu1 %v1960_v37 }
 0xbe5   :  { %vm2784_vm6 = vcmp.eq.s32.totalorder %v2783_v38, 1 }
 0xbe6   :  { %vm2785_vm7 = vmand %vm128_vm4, %vm2784_vm6 }
 0xbe7   :  { %v2786_v23 = vsel %vm2785_vm7, 0.0, %v4830_v29 }
 0xc70   :  { %v1965_v44 = vpop.xlane.xlu0 %1964 }
 0xc71   :  { %v1967_v45 = vmul.f32 0.03125, %v1965_v44  ;;  %v1962_v30 = vpop.xlane.xlu1 %1961 }
 0xc72   :  { %v1966_v46 = vmul.f32 0.03125, %v1962_v30 }
 0xc73   :  { %v1969_v47 = vadd.f32 1e-05, %v1967_v45 }
 0xc74   :  { %v1968_v48 = vadd.f32 1e-05, %v1966_v46 }
 0xc75   :  { %4627 = vrsqrt.f32 %v1969_v47 }
 0xc76   :  { %4629 = vrsqrt.f32 %v1968_v48 }
 0xc7f   :  { %v4628_v49 = vpop.eup %4627 }
 0xc80   :  { %v4630_v51 = vpop.eup %4629  ;;  %v1973_v52 = vmul.f32 %v4628_v49, %v1957_v34 }
 0xc81   :  { %v1972_v53 = vmul.f32 %v4630_v51, %v1956_v35 }
 0xc82   :  { %v1981_v55 = vmul.f32 %v4007_v50, %v1973_v52 }
 0xc83   :  { %v1980_v56 = vmul.f32 %v4007_v50, %v1972_v53 }
 0xc84   :  { %v5330_v58 = vadd.f32 %v4008_v54, %v1981_v55 }
 0xc85   :  { %v5328_v57 = vadd.f32 %v4008_v54, %v1980_v56 }
 0xc87   :  { %4342 = vmatprep.mubr.msk.f32.mxu1 %vm140_vm0, %v5328_v57 }
 0xc88   :  { %4343 = vmatmul.mubr.msk.f32.vlgmr.msra.gmra.mrb[22].mxu1 %vm140_vm0, %v5330_v58 }
 0xc89   :  { %4347 = vmatprep.mubr.msk.f32.mxu1 %vm4821_vm1, %v4820_v8 }
 0xd5b   :  { %v4344_v60 = vpop.f32.mrb[22].mxu1 }
 0xd5c   :  { %v2075_v61 = vpop.f32.mrb[23].mxu1  ;;  %v5352_v63 = vadd.f32 %v4344_v60, %v4013_v59 }
 0xd5d   :  { %v5338_v62 = vadd.f32 %v4013_v59, %v2075_v61 }
 0xd5f   :  { %2263 = vrot.lane.b32.xlu0 %v5338_v62, %s4824_s23  ;;  %2095 = vrot.lane.b32.xlu1 %v5338_v62, %s4823_s19 }
 0xd63   :  { %2433 = vrot.lane.b32.xlu0 %v5338_v62, %s4827_s27  ;;  %2261 = vrot.lane.b32.xlu1 %v5338_v62, %s4825_s25 }
 0xd67   :  { %2605 = vrot.lane.b32.xlu0 %v5338_v62, %s4828_s28  ;;  %2435 = vrot.lane.b32.xlu1 %v5338_v62, %s4826_s26 }
 0xd6b   :  { %2956 = vrot.lane.b32.xlu0 %v5352_v63, %s4824_s23  ;;  %2607 = vrot.lane.b32.xlu1 %v5338_v62, %s4831_s29 }
 0xd6f   :  { %3128 = vrot.lane.b32.xlu0 %v5352_v63, %s4826_s26  ;;  %2788 = vrot.lane.b32.xlu1 %v5352_v63, %s4823_s19 }
 0xd73   :  { %3300 = vrot.lane.b32.xlu0 %v5352_v63, %s4831_s29  ;;  %2954 = vrot.lane.b32.xlu1 %v5352_v63, %s4825_s25 }
 0xd77   :  { %2184 = vrot.lane.b32.xlu0 %v5338_v62, %s4822_s16  ;;  %3126 = vrot.lane.b32.xlu1 %v5352_v63, %s4827_s27  ;;  %s5664_s27 = smov 48  }
 0xd7b   :  { %3298 = vrot.lane.b32.xlu1 %v5352_v63, %s4828_s28  ;;  %s5666_s28 = smov 24  }
 0xd7f   :  { %2352 = vrot.lane.b32.xlu1 %v5338_v62, %s4833_s22 }
 0xdd1   :  { %v2264_v0 = vpop.permute.xlu0 %2263  ;;  %v2096_v1 = vpop.permute.xlu1 %2095 }
 0xdd2   :  { %4346 = vmatpush3.xpose.msk.msra.mxu1 %vm235_vm2, %v2096_v1  ;;  %4356 = vmatpush3.xpose.msk.msra.mxu0 %vm235_vm2, %v2264_v0 }
 0xdd3   :  { %4365 = vmatprep.subr.mxu0 %v4820_v8  ;;  %4350 = vmatprep.subr.mxu1 %v4820_v8 }
 0xdd5   :  { %v2434_v2 = vpop.permute.xlu0 %2433  ;;  %4348 = vmatmul.mubr.msk.f32.vlgmr.msra.gmra.mrb[24].mxu1 %vm235_vm2, %v5338_v62  ;;  %v2262_v3 = vpop.permute.xlu1 %2261 }
 0xdd6   :  { %4358 = vmatmul.mubr.msk.f32.vlgmr.msra.gmra.mrb[18].mxu0 %vm235_vm2, %v2262_v3  ;;  %4352 = vmatprep.mubr.msk.f32.mxu1 %vm4821_vm1, %v4820_v8 }
 0xdd7   :  { %4367 = vmatprep.mubr.msk.f32.mxu0 %vm4821_vm1, %v4820_v8 }
 0xdd9   :  { %v2606_v4 = vpop.permute.xlu0 %2605  ;;  %v2436_v6 = vpop.permute.xlu1 %2435 }
 0xdda   :  { %4366 = vmatpush3.xpose.msk.msra.mxu0 %vm235_vm2, %v2436_v6 }
 0xddb   :  { %4375 = vmatprep.subr.mxu0 %v4820_v8 }
 0xddd   :  { %v2957_v9 = vpop.permute.xlu0 %2956  ;;  %4368 = vmatmul.mubr.msk.f32.vlgmr.msra.gmra.mrb[20].mxu0 %vm235_vm2, %v2434_v2  ;;  %v2608_v10 = vpop.permute.xlu1 %2607 }
 0xdde   :  { %4376 = vmatpush3.xpose.msk.msra.mxu0 %vm235_vm2, %v2608_v10  ;;  %4377 = vmatprep.mubr.msk.f32.mxu0 %vm4821_vm1, %v4820_v8 }
 0xddf   :  { %4385 = vmatprep.subr.mxu0 %v4820_v8 }
 0xde1   :  { %v3129_v12 = vpop.permute.xlu0 %3128  ;;  %4378 = vmatmul.mubr.msk.f32.vlgmr.msra.gmra.mrb[22].mxu0 %vm235_vm2, %v2606_v4  ;;  %v2789_v14 = vpop.permute.xlu1 %2788 }
 0xde2   :  { %4386 = vmatpush3.xpose.msk.msra.mxu0 %vm235_vm2, %v2789_v14  ;;  %4387 = vmatprep.mubr.msk.f32.mxu0 %vm4821_vm1, %v4820_v8 }
 0xde3   :  { %4395 = vmatprep.subr.mxu0 %v4820_v8 }
 0xde5   :  { %v3301_v15 = vpop.permute.xlu0 %3300  ;;  %4388 = vmatmul.mubr.msk.f32.vlgmr.msra.gmra.mrb[24].mxu0 %vm235_vm2, %v5352_v63  ;;  %v2955_v16 = vpop.permute.xlu1 %2954 }
 0xde6   :  { %4396 = vmatpush3.xpose.msk.msra.mxu0 %vm235_vm2, %v2957_v9  ;;  %4397 = vmatprep.mubr.msk.f32.mxu0 %vm4821_vm1, %v4820_v8 }
 0xde7   :  { %4405 = vmatprep.subr.mxu0 %v4820_v8 }
 0xde9   :  { %v2185_v17 = vpop.permute.xlu0 %2184  ;;  %4398 = vmatmul.mubr.msk.f32.vlgmr.msra.gmra.mrb[26].mxu0 %vm235_vm2, %v2955_v16  ;;  %v3127_v18 = vpop.permute.xlu1 %3126 }
 0xdea   :  { %4351 = vmatpush3.msra.mxu1 %v2185_v17  ;;  %4406 = vmatpush3.xpose.msk.msra.mxu0 %vm235_vm2, %v3129_v12 }
 0xdeb   :  { %4407 = vmatprep.mubr.msk.f32.mxu0 %vm4821_vm1, %v4820_v8  ;;  %4415 = vmatprep.subr.mxu0 %v4820_v8 }
 0xdec   :  { %4360 = vmatprep.subr.mxu1 %v4820_v8 }
 0xded   :  { %4408 = vmatmul.mubr.msk.f32.vlgmr.msra.gmra.mrb[28].mxu0 %vm235_vm2, %v3127_v18  ;;  %v3299_v19 = vpop.permute.xlu1 %3298 }
 0xdee   :  { %4416 = vmatpush3.xpose.msk.msra.mxu0 %vm235_vm2, %v3301_v15  ;;  %4417 = vmatprep.mubr.msk.f32.mxu0 %vm4821_vm1, %v4820_v8 }
 0xdf1   :  { %4418 = vmatmul.mubr.msk.f32.vlgmr.msra.gmra.mrb[30].mxu0 %vm235_vm2, %v3299_v19  ;;  %v5444_v4 = vpop.permute.xlu1 %2352 }
 0xea8   :  { %v2167_v13 = vpop.f32.mrb[24].mxu1 }
 0xea9   :  { %v2171_v31 = vmul.f32 0.35355338, %v2167_v13  ;;  %v4349_v11 = vpop.f32.mrb[25].mxu1  ;;  %v2335_v32 = vpop.f32.mrb[18].mxu0 }
 0xeaa   :  { %v2339_v33 = vmul.f32 0.35355338, %v2335_v32  ;;  %v4359_v34 = vpop.f32.mrb[19].mxu0 }
 0xeab   :  { %v2172_v35 = vadd.f32 %v2171_v31, %v2093_v28 }
 0xeac   :  { %v2340_v7 = vadd.f32 %v2339_v33, %v2093_v28 }
 0xead   :  { %v2173_v5 = vsel %vm235_vm2, %v2172_v35, -inf }
 0xeae   :  { %2174 = vmax.xlane.f32.xlu0 %v2173_v5  ;;  %v2341_v37 = vsel %vm235_vm2, %v2340_v7, -inf }
 0xeaf   :  { %2342 = vmax.xlane.f32.xlu1 %v2341_v37 }
 0xeb0   :  { %v2507_v39 = vpop.f32.mrb[20].mxu0 }
 0xeb1   :  { %v2511_v40 = vmul.f32 0.35355338, %v2507_v39  ;;  %v4369_v41 = vpop.f32.mrb[21].mxu0 }
 0xeb3   :  { %v2512_v42 = vadd.f32 %v2511_v40, %v2093_v28 }
 0xeb4   :  { %v2679_v43 = vpop.f32.mrb[22].mxu0 }
 0xeb5   :  { %v2683_v44 = vmul.f32 0.35355338, %v2679_v43  ;;  %v4379_v45 = vpop.f32.mrb[23].mxu0  ;;  %v2513_v30 = vsel %vm235_vm2, %v2512_v42, -inf }
 0xeb6   :  { %2514 = vmax.xlane.f32.xlu0 %v2513_v30 }
 0xeb7   :  { %v2684_v24 = vadd.f32 %v2683_v44, %v2093_v28 }
 0xeb8   :  { %v2860_v46 = vpop.f32.mrb[24].mxu0 }
 0xeb9   :  { %v2864_v47 = vmul.f32 0.35355338, %v2860_v46  ;;  %v4389_v48 = vpop.f32.mrb[25].mxu0  ;;  %v2685_v49 = vsel %vm235_vm2, %v2684_v24, -inf }
 0xeba   :  { %2686 = vmax.xlane.f32.xlu0 %v2685_v49 }
 0xebb   :  { %v2865_v50 = vadd.f32 %v2864_v47, %v2786_v23 }
 0xebc   :  { %v3028_v51 = vpop.f32.mrb[26].mxu0 }
 0xebd   :  { %v3032_v52 = vmul.f32 0.35355338, %v3028_v51  ;;  %v4399_v53 = vpop.f32.mrb[27].mxu0  ;;  %v2866_v54 = vsel %vm235_vm2, %v2865_v50, -inf }
 0xebe   :  { %2867 = vmax.xlane.f32.xlu1 %v2866_v54 }
 0xebf   :  { %v3033_v55 = vadd.f32 %v3032_v52, %v2786_v23 }
 0xec0   :  { %v3200_v22 = vpop.f32.mrb[28].mxu0 }
 0xec1   :  { %v3204_v26 = vmul.f32 0.35355338, %v3200_v22  ;;  %v4409_v56 = vpop.f32.mrb[29].mxu0  ;;  %v3034_v59 = vsel %vm235_vm2, %v3033_v55, -inf }
 0xec2   :  { %3035 = vmax.xlane.f32.xlu0 %v3034_v59 }
 0xec3   :  { %v3205_v29 = vadd.f32 %v3204_v26, %v2786_v23 }
 0xec4   :  { %v3372_v60 = vpop.f32.mrb[30].mxu0 }
 0xec5   :  { %v3376_v61 = vmul.f32 0.35355338, %v3372_v60  ;;  %v4419_v0 = vpop.f32.mrb[31].mxu0  ;;  %v3206_v1 = vsel %vm235_vm2, %v3205_v29, -inf }
 0xec6   :  { %3207 = vmax.xlane.f32.xlu1 %v3206_v1 }
 0xec7   :  { %v3377_v2 = vadd.f32 %v3376_v61, %v2786_v23 }
 0xec9   :  { %v3378_v3 = vsel %vm235_vm2, %v3377_v2, -inf }
 0xeca   :  { %3379 = vmax.xlane.f32.xlu0 %v3378_v3 }
 0xed7   :  { %2696 = vrot.lane.b32.xlu1 %v5338_v62, %s5663_s1 }
 0xee0   :  { %2524 = vrot.lane.b32.xlu0 %v5338_v62, %s5664_s27 }
 0xf3b   :  { %v2175_v6 = vpop.xlane.xlu0 %2174 }
 0xf3c   :  { %v2176_v9 = vsub.f32 %v2172_v35, %v2175_v6  ;;  %v2343_v10 = vpop.xlane.xlu1 %2342 }
 0xf3d   :  { %v2344_v12 = vsub.f32 %v2340_v7, %v2343_v10 }
 0xf3e   :  { %v2177_v14 = vmul.f32 1.442695, %v2176_v9 }
 0xf3f   :  { %v2345_v15 = vmul.f32 1.442695, %v2344_v12 }
 0xf40   :  { %4631 = vpow2.f32 %v2177_v14 }
 0xf41   :  { %4633 = vpow2.f32 %v2345_v15 }
 0xf43   :  { %v2515_v16 = vpop.xlane.xlu0 %2514 }
 0xf44   :  { %v2516_v17 = vsub.f32 %v2512_v42, %v2515_v16 }
 0xf46   :  { %v2517_v18 = vmul.f32 1.442695, %v2516_v17 }
 0xf47   :  { %v2687_v19 = vpop.xlane.xlu0 %2686 }
 0xf48   :  { %4635 = vpow2.f32 %v2517_v18  ;;  %v2688_v20 = vsub.f32 %v2684_v24, %v2687_v19 }
 0xf4a   :  { %v4632_v21 = vpop.eup %4631  ;;  %v2689_v25 = vmul.f32 1.442695, %v2688_v20 }
 0xf4b   :  { %v4634_v27 = vpop.eup %4633  ;;  %v2179_v62 = vsel %vm235_vm2, %v4632_v21, 0.0  ;;  %v2868_v33 = vpop.xlane.xlu1 %2867 }
 0xf4c   :  { %4637 = vpow2.f32 %v2689_v25  ;;  %2180 = vadd.xlane.f32.xlu1 %v2179_v62  ;;  %v2347_v13 = vsel %vm235_vm2, %v4634_v27, 0.0  ;;  %v2869_v34 = vsub.f32 %v2865_v50, %v2868_v33  ;;  %v4042_v33 = vld [vmem:[%s5633_s4 + $0x30] sm:$0xff] }
 0xf4d   :  { %2348 = vadd.xlane.f32.xlu0 %v2347_v13 }
 0xf4e   :  { %v2870_v5 = vmul.f32 1.442695, %v2869_v34  ;;  %v4043_v34 = vld [vmem:[%s5633_s4 + $0x38] sm:$0xff] }
 0xf4f   :  { %v3036_v35 = vpop.xlane.xlu0 %3035 }
 0xf50   :  { %v3037_v7 = vsub.f32 %v3033_v55, %v3036_v35  ;;  %4639 = vpow2.f32 %v2870_v5 }
 0xf52   :  { %v4636_v28 = vpop.eup %4635  ;;  %v3038_v39 = vmul.f32 1.442695, %v3037_v7 }
 0xf53   :  { %v2519_v31 = vsel %vm235_vm2, %v4636_v28, 0.0  ;;  %v3208_v36 = vpop.xlane.xlu1 %3207 }
 0xf54   :  { %2520 = vadd.xlane.f32.xlu1 %v2519_v31  ;;  %v3209_v37 = vsub.f32 %v3205_v29, %v3208_v36  ;;  %4641 = vpow2.f32 %v3038_v39  ;;  %v4041_v31 = vld [vmem:[%s5633_s4 + $0x28] sm:$0xff]  ;;  %v4529_v36 = vpack.c.bf16 %v4043_v34, %v4042_v33 }
 0xf56   :  { %v5449_v11 = vpop.eup %4637  ;;  %v3210_v40 = vmul.f32 1.442695, %v3209_v37 }
 0xf57   :  { %v2691_v32 = vsel %vm235_vm2, %v5449_v11, 0.0  ;;  %v3380_v38 = vpop.xlane.xlu0 %3379  ;;  %v2697_v48 = vpop.permute.xlu1 %2696 }
 0xf58   :  { %2692 = vadd.xlane.f32.xlu0 %v2691_v32  ;;  %v3381_v41 = vsub.f32 %v3377_v2, %v3380_v38  ;;  %4643 = vpow2.f32 %v3210_v40 }
 0xf5a   :  { %v3382_v42 = vmul.f32 1.442695, %v3381_v41  ;;  %v4640_v43 = vpop.eup %4639 }
 0xf5b   :  { %v2872_v45 = vsel %vm235_vm2, %v4640_v43, 0.0  ;;  %v2525_v49 = vpop.permute.xlu0 %2524 }
 0xf5c   :  { %4645 = vpow2.f32 %v3382_v42 }
 0xf5e   :  { %v5457_v44 = vpop.eup %4641 }
 0xf5f   :  { %v3040_v24 = vsel %vm235_vm2, %v5457_v44, 0.0 }
 0xf62   :  { %v5460_v30 = vpop.eup %4643 }
 0xf63   :  { %v3212_v46 = vsel %vm235_vm2, %v5460_v30, 0.0 }
 0xf65   :  { %3045 = vrot.lane.b32.xlu1 %v5352_v63, %s4833_s22 }
 0xf66   :  { %v5466_v23 = vpop.eup %4645 }
 0xf67   :  { %v3384_v47 = vsel %vm235_vm2, %v5466_v23, 0.0 }
 0xf6e   :  { %2877 = vrot.lane.b32.xlu0 %v5352_v63, %s4822_s16  ;;  %s5665_s16 = smov 8  }
 0xf89   :  { %2873 = vadd.xlane.f32.xlu1 %v2872_v45 }
 0xf8d   :  { %3041 = vadd.xlane.f32.xlu0 %v3040_v24  ;;  %3213 = vadd.xlane.f32.xlu1 %v3212_v46 }
 0xf91   :  { %3385 = vadd.xlane.f32.xlu1 %v3384_v47 }
 0xfa2   :  { %3389 = vrot.lane.b32.xlu1 %v5352_v63, %s5663_s1 }
 0xfa3   :  { %3217 = vrot.lane.b32.xlu0 %v5352_v63, %s5664_s27 }
 0xfd9   :  { %v2181_v50 = vpop.xlane.xlu1 %2180 }
 0xfda   :  { %4647 = vrcp.f32 %v2181_v50  ;;  %v2349_v51 = vpop.xlane.xlu0 %2348 }
 0xfdb   :  { %4649 = vrcp.f32 %v2349_v51 }
 0xfe1   :  { %v2521_v52 = vpop.xlane.xlu1 %2520 }
 0xfe2   :  { %4651 = vrcp.f32 %v2521_v52 }
 0xfe4   :  { %v4648_v53 = vpop.eup %4647 }
 0xfe5   :  { %v2183_v54 = vmul.f32 %v4648_v53, %v4632_v21  ;;  %v2693_v55 = vpop.xlane.xlu0 %2692  ;;  %v4650_v22 = vpop.eup %4649 }
 0xfe6   :  { %4653 = vrcp.f32 %v2693_v55  ;;  %v2351_v63 = vmul.f32 %v4650_v22, %v4634_v27  ;;  %v3046_v61 = vpop.permute.xlu1 %3045 }
 0xfe7   :  { %4353 = vmatmul.mubr.msk.f32.vlgmr.msra.gmra.mrb[26].mxu1 %vm235_vm2, %v2183_v54 }
 0xfe8   :  { %4361 = vmatpush3.msra.mxu1 %v5444_v4  ;;  %4362 = vmatprep.mubr.msk.f32.mxu1 %vm4821_vm1, %v4820_v8 }
 0xfe9   :  { %4370 = vmatprep.subr.mxu1 %v4820_v8  ;;  %v2878_v60 = vpop.permute.xlu0 %2877 }
 0xfeb   :  { %4363 = vmatmul.mubr.msk.f32.vlgmr.msra.gmra.mrb[28].mxu1 %vm235_vm2, %v2351_v63 }
 0xfec   :  { %v4652_v26 = vpop.eup %4651  ;;  %4371 = vmatpush3.msra.mxu1 %v2525_v49  ;;  %4372 = vmatprep.mubr.msk.f32.mxu1 %vm4821_vm1, %v4820_v8 }
 0xfed   :  { %v2523_v56 = vmul.f32 %v4652_v26, %v4636_v28  ;;  %4380 = vmatprep.subr.mxu1 %v4820_v8  ;;  %v4040_v28 = vld [vmem:[%s5633_s4 + $0x20] sm:$0xff] }
 0xfef   :  { %4373 = vmatmul.mubr.msk.f32.vlgmr.msra.gmra.mrb[30].mxu1 %vm235_vm2, %v2523_v56 }
 0xff0   :  { %v4654_v59 = vpop.eup %4653  ;;  %4381 = vmatpush3.msra.mxu1 %v2697_v48  ;;  %4382 = vmatprep.mubr.msk.f32.mxu1 %vm4821_vm1, %v4820_v8 }
 0xff1   :  { %v2695_v29 = vmul.f32 %v4654_v59, %v5449_v11  ;;  %4390 = vmatprep.subr.mxu1 %v4820_v8  ;;  %v4525_v11 = vpack.c.bf16 %v4041_v31, %v4040_v28  ;;  %v4050_v31 = vld [vmem:[%s5640_s11 + $0x1] ss:$0 sm:$0xff] }
 0xff3   :  { %4383 = vmatmul.mubr.msk.f32.vlgmr.msra.gmra.mrb[32].mxu1 %vm235_vm2, %v2695_v29  ;;  %4526 = vmatprep.subr.bf16.mxu0 %v4525_v11 }
 0xff4   :  { %4391 = vmatpush3.msra.mxu1 %v2878_v60  ;;  %4392 = vmatprep.mubr.msk.f32.mxu1 %vm4821_vm1, %v4820_v8 }
 0xff5   :  { %4400 = vmatprep.subr.mxu1 %v4820_v8  ;;  %4528 = vmatpush3.bf16.msra.mxu0 %v4525_v11 }
 0xff6   :  { %4530 = vmatprep.subr.bf16.mxu0 %v4529_v36 }
 0xff9   :  { %4532 = vmatpush3.bf16.msra.mxu0 %v4529_v36 }
0x1016   :  { %v2874_v0 = vpop.xlane.xlu1 %2873 }
0x1017   :  { %4655 = vrcp.f32 %v2874_v0  ;;  %v4052_v0 = vld [vmem:[%s5635_s6 + $0x28] sm:$0xff] }
0x101a   :  { %v3042_v1 = vpop.xlane.xlu0 %3041  ;;  %v3214_v2 = vpop.xlane.xlu1 %3213 }
0x101b   :  { %4657 = vrcp.f32 %v3042_v1 }
0x101c   :  { %4659 = vrcp.f32 %v3214_v2  ;;  %v4053_v2 = vld [vmem:[%s5635_s6 + $0x30] sm:$0xff] }
0x101e   :  { %v3386_v3 = vpop.xlane.xlu1 %3385  ;;  %v3218_v14 = vpop.permute.xlu0 %3217 }
0x101f   :  { %4661 = vrcp.f32 %v3386_v3  ;;  %v4054_v3 = vld [vmem:[%s5635_s6 + $0x38] sm:$0xff] }
0x1021   :  { %v4656_v4 = vpop.eup %4655 }
0x1022   :  { %v2876_v6 = vmul.f32 %v4656_v4, %v4640_v43  ;;  %v3390_v17 = vpop.permute.xlu1 %3389  ;;  %v4537_v4 = vpack.c.bf16 %v4054_v3, %v4053_v2 }
0x1024   :  { %4393 = vmatmul.mubr.msk.f32.vlgmr.msra.gmra.mrb[34].mxu1 %vm235_vm2, %v2876_v6  ;;  %v4058_v6 = vld [vmem:[%s5637_s8 + $0x40] sm:$0xff] }
0x1025   :  { %v4658_v9 = vpop.eup %4657  ;;  %4401 = vmatpush3.msra.mxu1 %v3046_v61  ;;  %4402 = vmatprep.mubr.msk.f32.mxu1 %vm4821_vm1, %v4820_v8 }
0x1026   :  { %v3044_v10 = vmul.f32 %v4658_v9, %v5457_v44  ;;  %4410 = vmatprep.subr.mxu1 %v4820_v8  ;;  %v4660_v12 = vpop.eup %4659  ;;  %v4059_v9 = vld [vmem:[%s5637_s8 + $0x48] sm:$0xff] }
0x1027   :  { %v3216_v15 = vmul.f32 %v4660_v12, %v5460_v30  ;;  %v4541_v12 = vpack.c.bf16 %v4059_v9, %v4058_v6 }
0x1028   :  { %4403 = vmatmul.mubr.msk.f32.vlgmr.msra.gmra.mrb[36].mxu1 %vm235_vm2, %v3044_v10  ;;  %v4060_v10 = vld [vmem:[%s5637_s8 + $0x50] sm:$0xff] }
0x1029   :  { %4411 = vmatpush3.msra.mxu1 %v3218_v14  ;;  %4412 = vmatprep.mubr.msk.f32.mxu1 %vm4821_vm1, %v4820_v8  ;;  %v4662_v16 = vpop.eup %4661  ;;  %v4061_v14 = vld [vmem:[%s5637_s8 + $0x58] sm:$0xff] }
0x102a   :  { %4420 = vmatprep.subr.mxu1 %v4820_v8  ;;  %v3388_v18 = vmul.f32 %v4662_v16, %v5466_v23  ;;  %v4044_v23 = vld [vmem:[#allocation8 + $0x1] ss:$0 sm:$0xff]  ;;  %4542 = vmatprep.subr.bf16.mxu0 %v4541_v12 }
0x102b   :  { %v4062_v16 = vld [vmem:[%s5637_s8 + $0x60] sm:$0xff] }
0x102c   :  { %4413 = vmatmul.mubr.msk.f32.vlgmr.msra.gmra.mrb[38].mxu1 %vm235_vm2, %v3216_v15  ;;  %v4545_v15 = vpack.c.bf16 %v4061_v14, %v4060_v10 }
0x102d   :  { %4421 = vmatpush3.msra.mxu1 %v3390_v17  ;;  %4422 = vmatprep.mubr.msk.f32.mxu1 %vm4821_vm1, %v4820_v8  ;;  %v4063_v17 = vld [vmem:[%s5637_s8 + $0x68] sm:$0xff] }
0x1030   :  { %4423 = vmatmul.mubr.msk.f32.vlgmr.msra.gmra.mrb[40].mxu1 %vm235_vm2, %v3388_v18  ;;  %v4549_v18 = vpack.c.bf16 %v4063_v17, %v4062_v16  ;;  %v4072_v17 = vld [vmem:[%s5642_s13 + $0x1] ss:$0 sm:$0xff] }
0x10ba   :  { %v2256_v19 = vpop.f32.mrb[26].mxu1 }
0x10bb   :  { %2260 = vst.msk [vmem:[#allocation2] sm:$0xff] %vm235_vm2, %v2256_v19  ;;  %v4354_v20 = vpop.f32.mrb[27].mxu1 }
0x10be   :  { %v2424_v21 = vpop.f32.mrb[28].mxu1 }
0x10bf   :  { %2429 = vrot.lane.b32.xlu0 %v2424_v21, %s5665_s16  ;;  %v4364_v25 = vpop.f32.mrb[29].mxu1 }
0x10c2   :  { %v2596_v27 = vpop.f32.mrb[30].mxu1 }
0x10c3   :  { %2601 = vrot.lane.b32.xlu1 %v2596_v27, %s5662_s20  ;;  %v4374_v62 = vpop.f32.mrb[31].mxu1 }
0x10c6   :  { %v2768_v13 = vpop.f32.mrb[32].mxu1 }
0x10c7   :  { %2773 = vrot.lane.b32.xlu1 %v2768_v13, %s5666_s28  ;;  %v4384_v8 = vpop.f32.mrb[33].mxu1 }
0x10c8   :  { %v4049_v8 = vld [vmem:[%s5639_s10 + $0x1] ss:$0 sm:$0xff] }
0x10f7   :  { %v2949_v32 = vpop.f32.mrb[34].mxu1 }
0x10f8   :  { %2953 = vst.msk [vmem:[#allocation2 + $0x8] sm:$0xff] %vm235_vm2, %v2949_v32  ;;  %v4394_v35 = vpop.f32.mrb[35].mxu1 }
0x10fb   :  { %v3117_v7 = vpop.f32.mrb[36].mxu1 }
0x10fc   :  { %3122 = vrot.lane.b32.xlu0 %v3117_v7, %s5665_s16  ;;  %v4404_v5 = vpop.f32.mrb[37].mxu1  ;;  %v4064_v7 = vld [vmem:[%s5637_s8 + $0x70] sm:$0xff] }
0x10fd   :  { %v4065_v5 = vld [vmem:[%s5637_s8 + $0x78] sm:$0xff] }
0x10ff   :  { %v3289_v37 = vpop.f32.mrb[38].mxu1 }
0x1100   :  { %3294 = vrot.lane.b32.xlu0 %v3289_v37, %s5662_s20  ;;  %v4414_v38 = vpop.f32.mrb[39].mxu1  ;;  %v4553_v37 = vpack.c.bf16 %v4065_v5, %v4064_v7 }
0x1101   :  { %v4055_v38 = vld [vmem:[#allocation9 + $0x1] ss:$0 sm:$0xff] }
0x1103   :  { %v3461_v39 = vpop.f32.mrb[40].mxu1 }
0x1104   :  { %3466 = vrot.lane.b32.xlu1 %v3461_v39, %s5666_s28  ;;  %v4424_v40 = vpop.f32.mrb[41].mxu1 }
0x1131   :  { %v2430_v41 = vpop.permute.xlu0 %2429 }
0x1132   :  { %2432 = vst.msk [vmem:[#allocation2] sm:$0xff] %vm571_vm10, %v2430_v41 }
0x1135   :  { %v2602_v42 = vpop.permute.xlu1 %2601 }
0x1136   :  { %2604 = vst.msk [vmem:[#allocation2] sm:$0xff] %vm744_vm11, %v2602_v42 }
0x1139   :  { %v2774_v43 = vpop.permute.xlu1 %2773 }
0x113a   :  { %2776 = vst.msk [vmem:[#allocation2] sm:$0xff] %vm917_vm12, %v2774_v43 }
0x1141   :  { %v3470_v44 = vld [vmem:[#allocation2] sm:$0xff] }
0x1142   :  { %4433 = vmatprep.mubr.msk.f32.mxu0 %vm140_vm0, %v3470_v44 }
0x116e   :  { %v3123_v45 = vpop.permute.xlu0 %3122 }
0x116f   :  { %3125 = vst.msk [vmem:[#allocation2 + $0x8] sm:$0xff] %vm571_vm10, %v3123_v45  ;;  %v4066_v45 = vld [vmem:[#allocation11 + $0x1] ss:$0 sm:$0xff] }
0x1172   :  { %v3295_v30 = vpop.permute.xlu0 %3294 }
0x1173   :  { %3297 = vst.msk [vmem:[#allocation2 + $0x8] sm:$0xff] %vm744_vm11, %v3295_v30 }
0x1176   :  { %v3467_v24 = vpop.permute.xlu1 %3466 }
0x1177   :  { %3469 = vst.msk [vmem:[#allocation2 + $0x8] sm:$0xff] %vm917_vm12, %v3467_v24 }
0x117e   :  { %v3471_v46 = vld [vmem:[#allocation2 + $0x8] sm:$0xff] }
0x117f   :  { %4434 = vmatmul.mubr.msk.f32.vlgmr.msra.gmra.mrb[32].mxu0 %vm140_vm0, %v3471_v46 }
0x1180   :  { %4544 = vmatpush3.bf16.msra.mxu0 %v4541_v12  ;;  %v4071_v12 = vld [vmem:[%s5641_s12 + $0x1] ss:$0 sm:$0xff]  ;;  %s4836_s12 = smov [#allocation12]  }
0x1181   :  { %4546 = vmatprep.subr.bf16.mxu0 %v4545_v15  ;;  %s3955_s22 = sshll.u32 %s4836_s12, 4  ;;  %s3956_s22 = int_to_ptr.vmem [resolvable:$true] %s3955_s22 }
0x1182   :  { %s4781_s13 = scalar_lea.vmem %s3956_s22, 256  ;;  %p4786_p13 = scmp.lt.s32.totalorder %s3956_s22, %s3956_s22 }
0x1183   :  { %p4782_p12 = scmp.ne.s32.totalorder %s3956_s22, %s4781_s13  ;;  %p4787_p0 = scmp.lt.s32.totalorder %s4781_s13, %s4781_s13 }
0x1184   :  { %4548 = vmatpush3.bf16.msra.mxu0 %v4545_v15 }
0x1185   :  { %4550 = vmatprep.subr.bf16.mxu0 %v4549_v18  ;;  %p4788_p1 = por %p4787_p0, %p4786_p13 }
0x1187   :  { %p4789_p2 = pnand %p4788_p1, %p4782_p12 }
0x1188   :  { %4552 = vmatpush3.bf16.msra.mxu0 %v4549_v18 }
0x1189   :  { %4554 = vmatprep.subr.bf16.mxu0 %v4553_v37 }
0x118c   :  { %4556 = vmatpush3.bf16.msra.mxu0 %v4553_v37 }
0x1252   :  { %v4435_v47 = vpop.f32.mrb[32].mxu0 }
0x1253   :  { %v3563_v48 = vadd.f32 %v4435_v47, %v4044_v23  ;;  %v3557_v49 = vpop.f32.mrb[33].mxu0 }
0x1254   :  { %v3558_v50 = vadd.f32 %v4044_v23, %v3557_v49 }
0x1255   :  { %v3567_v51 = vadd.f32 %v3563_v48, %v5330_v58 }
0x1256   :  { %v3566_v52 = vadd.f32 %v3558_v50, %v5328_v57  ;;  %v4051_v57 = vld [vmem:[%s5635_s6 + $0x20] sm:$0xff] }
0x1257   :  { %v3575_v53 = vsel %vm140_vm0, %v3567_v51, 0.0  ;;  %v4533_v1 = vpack.c.bf16 %v4052_v0, %v4051_v57  ;;  %v3859_v57 = vld [vmem:[%s5643_s14 + $0x18] sm:$0xff] }
0x1258   :  { %3576 = vadd.xlane.f32.xlu1 %v3575_v53  ;;  %v3572_v54 = vsel %vm140_vm0, %v3566_v52, 0.0 }
0x1259   :  { %3573 = vadd.xlane.f32.xlu0 %v3572_v54  ;;  %4534 = vmatprep.subr.bf16.mxu1 %v4533_v1 }
0x125a   :  { %4536 = vmatpush3.bf16.msra.mxu1 %v4533_v1 }
0x125b   :  { %4538 = vmatprep.subr.bf16.mxu1 %v4537_v4 }
0x125e   :  { %4540 = vmatpush3.bf16.msra.mxu1 %v4537_v4 }
0x12e5   :  { %v3577_v55 = vpop.xlane.xlu1 %3576 }
0x12e6   :  { %v3579_v22 = vmul.f32 0.03125, %v3577_v55  ;;  %v3574_v63 = vpop.xlane.xlu0 %3573 }
0x12e7   :  { %v3578_v26 = vmul.f32 0.03125, %v3574_v63 }
0x12e8   :  { %v3581_v56 = vsub.f32 %v3567_v51, %v3579_v22 }
0x12e9   :  { %v3580_v59 = vsub.f32 %v3566_v52, %v3578_v26 }
0x12ea   :  { %v3583_v61 = vmul.f32 %v3581_v56, %v3581_v56 }
0x12eb   :  { %v3582_v29 = vmul.f32 %v3580_v59, %v3580_v59 }
0x12ec   :  { %v3587_v58 = vsel %vm140_vm0, %v3583_v61, 0.0 }
0x12ed   :  { %v3584_v60 = vsel %vm140_vm0, %v3582_v29, 0.0  ;;  %v3856_v29 = vld [vmem:[%s5643_s14] sm:$0xff] }
0x12ee   :  { %3585 = vadd.xlane.f32.xlu0 %v3584_v60  ;;  %v3857_v60 = vld [vmem:[%s5643_s14 + $0x8] sm:$0xff] }
0x12ef   :  { %v4557_v61 = vpack.c.bf16 %v3857_v60, %v3856_v29 }
0x12f1   :  { %4558 = vmatprep.subr.bf16.mxu1 %v4557_v61 }
0x12f2   :  { %3588 = vadd.xlane.f32.xlu0 %v3587_v58  ;;  %v3858_v58 = vld [vmem:[%s5643_s14 + $0x10] sm:$0xff] }
0x12f3   :  { %v4561_v0 = vpack.c.bf16 %v3859_v57, %v3858_v58 }
0x137b   :  { %v3586_v19 = vpop.xlane.xlu0 %3585 }
0x137c   :  { %v3590_v20 = vmul.f32 0.03125, %v3586_v19 }
0x137e   :  { %v3592_v21 = vadd.f32 1e-05, %v3590_v20 }
0x137f   :  { %v3589_v25 = vpop.xlane.xlu0 %3588 }
0x1380   :  { %4663 = vrsqrt.f32 %v3592_v21  ;;  %v3591_v27 = vmul.f32 0.03125, %v3589_v25  ;;  %v4073_v25 = vld [vmem:[%s5644_s15] ss:$0 sm:$0xff] }
0x1382   :  { %v3593_v62 = vadd.f32 1e-05, %v3591_v27 }
0x1384   :  { %4665 = vrsqrt.f32 %v3593_v62 }
0x138a   :  { %v4664_v13 = vpop.eup %4663 }
0x138b   :  { %v3596_v28 = vmul.f32 %v4664_v13, %v3580_v59 }
0x138d   :  { %v3604_v11 = vmul.f32 %v4049_v8, %v3596_v28 }
0x138e   :  { %v4666_v32 = vpop.eup %4665 }
0x138f   :  { %v3597_v33 = vmul.f32 %v4666_v32, %v3581_v56  ;;  %v3612_v34 = vadd.f32 %v4050_v31, %v3604_v11 }
0x1391   :  { %v3605_v35 = vmul.f32 %v4049_v8, %v3597_v33  ;;  %4444 = vmatprep.mubr.msk.f32.mxu1 %vm140_vm0, %v3612_v34 }
0x1393   :  { %v3613_v36 = vadd.f32 %v4050_v31, %v3605_v35 }
0x1395   :  { %4445 = vmatmul.mubr.msk.f32.vlgmr.msra.gmra.mrb[42].mxu1 %vm140_vm0, %v3613_v36 }
0x1396   :  { %4560 = vmatpush3.bf16.msra.mxu1 %v4557_v61 }
0x1397   :  { %4562 = vmatprep.subr.bf16.mxu1 %v4561_v0 }
0x139a   :  { %4564 = vmatpush3.bf16.msra.mxu1 %v4561_v0 }
0x1468   :  { %v4446_v39 = vpop.f32.mrb[42].mxu1 }
0x1469   :  { %v3705_v40 = vadd.f32 %v4446_v39, %v4055_v38  ;;  %v3699_v41 = vpop.f32.mrb[43].mxu1 }
0x146a   :  { %v3700_v42 = vadd.f32 %v4055_v38, %v3699_v41 }
0x146b   :  { %v3709_v44 = vmax.f32 %v3705_v40, 0.0 }
0x146c   :  { %v3708_v43 = vmax.f32 %v3700_v42, 0.0 }
0x146e   :  { %4463 = vmatprep.mubr.msk.f32.mxu0 %vm1862_vm13, %v3708_v43 }
0x146f   :  { %4464 = vmatmul.mubr.msk.f32.vlgmr.msra.gmra.mrb[34].mxu0 %vm1862_vm13, %v3709_v44 }
0x1542   :  { %v4465_v30 = vpop.f32.mrb[34].mxu0 }
0x1543   :  { %v3805_v24 = vadd.f32 %v4465_v30, %v4066_v45  ;;  %v3799_v46 = vpop.f32.mrb[35].mxu0 }
0x1544   :  { %v3800_v23 = vadd.f32 %v4066_v45, %v3799_v46 }
0x1545   :  { %v3809_v47 = vadd.f32 %v3805_v24, %v3613_v36 }
0x1546   :  { %v3808_v48 = vadd.f32 %v3800_v23, %v3612_v34 }
0x1547   :  { %v3817_v49 = vsel %vm140_vm0, %v3809_v47, 0.0 }
0x1548   :  { %3818 = vadd.xlane.f32.xlu0 %v3817_v49  ;;  %v3814_v50 = vsel %vm140_vm0, %v3808_v48, 0.0 }
0x1549   :  { %3815 = vadd.xlane.f32.xlu1 %v3814_v50 }
0x15d5   :  { %v3819_v51 = vpop.xlane.xlu0 %3818 }
0x15d6   :  { %v3821_v52 = vmul.f32 0.03125, %v3819_v51  ;;  %v3816_v53 = vpop.xlane.xlu1 %3815 }
0x15d7   :  { %v3820_v54 = vmul.f32 0.03125, %v3816_v53 }
0x15d8   :  { %v3823_v55 = vsub.f32 %v3809_v47, %v3821_v52 }
0x15d9   :  { %v3822_v22 = vsub.f32 %v3808_v48, %v3820_v54 }
0x15da   :  { %v3825_v63 = vmul.f32 %v3823_v55, %v3823_v55 }
0x15db   :  { %v3824_v26 = vmul.f32 %v3822_v22, %v3822_v22 }
0x15dc   :  { %v3829_v56 = vsel %vm140_vm0, %v3825_v63, 0.0 }
0x15dd   :  { %3830 = vadd.xlane.f32.xlu0 %v3829_v56  ;;  %v3826_v59 = vsel %vm140_vm0, %v3824_v26, 0.0 }
0x15de   :  { %3827 = vadd.xlane.f32.xlu1 %v3826_v59 }
0x166a   :  { %v3831_v1 = vpop.xlane.xlu0 %3830 }
0x166b   :  { %v3833_v2 = vmul.f32 0.03125, %v3831_v1  ;;  %v3828_v3 = vpop.xlane.xlu1 %3827 }
0x166c   :  { %v3832_v4 = vmul.f32 0.03125, %v3828_v3 }
0x166d   :  { %v3835_v6 = vadd.f32 1e-05, %v3833_v2 }
0x166e   :  { %v3834_v9 = vadd.f32 1e-05, %v3832_v4 }
0x166f   :  { %4667 = vrsqrt.f32 %v3835_v6 }
0x1670   :  { %4669 = vrsqrt.f32 %v3834_v9 }
0x1679   :  { %v4668_v10 = vpop.eup %4667 }
0x167a   :  { %v4670_v14 = vpop.eup %4669  ;;  %v3839_v15 = vmul.f32 %v4668_v10, %v3823_v55 }
0x167b   :  { %v3838_v16 = vmul.f32 %v4670_v14, %v3822_v22 }
0x167c   :  { %v3847_v18 = vmul.f32 %v4071_v12, %v3839_v15 }
0x167d   :  { %v3846_v19 = vmul.f32 %v4071_v12, %v3838_v16 }
0x167e   :  { %v3855_v21 = vadd.f32 %v4072_v17, %v3847_v18 }
0x167f   :  { %v3854_v20 = vadd.f32 %v4072_v17, %v3846_v19 }
0x1681   :  { %4474 = vmatprep.mubr.msk.f32.mxu1 %vm140_vm0, %v3854_v20 }
0x1682   :  { %4475 = vmatmul.mubr.msk.f32.vlgmr.msra.gmra.mrb[44].mxu1 %vm140_vm0, %v3855_v21 }
0x1755   :  { %v4476_v27 = vpop.f32.mrb[44].mxu1 }
0x1756   :  { %v3945_v62 = vadd.f32 %v4476_v27, %v4073_v25  ;;  %v3939_v13 = vpop.f32.mrb[45].mxu1 }
0x1757   :  { %v3940_v8 = vadd.f32 %v4073_v25, %v3939_v13 }
0x1758   :  { %3949 = vst [vmem:[#allocation12 + $0x8] sm:$0xff] %v3945_v62 }
0x1759   :  { %3948 = vst [vmem:[#allocation12] sm:$0xff] %v3940_v8 }
0x175a   :  { %4792 = shalt.err (!%p4789_p2)
}
0x175b   :  { %s5667_s21 = sld [smem:[#allocation18_spill]] }
0x1761   :  { %s4793_s15 = scalar_lea.hbm %s5667_s21, 256 }
0x1762   :  { %p4794_p3 = scmp.ne.s32.totalorder %s5667_s21, %s4793_s15  ;;  %p4797_p4 = scmp.lt.u32.totalorder %s4793_s15, %s5667_s21 }
0x1764   :  { %p4799_p5 = pnand %p4797_p4, %p4794_p3 }
0x1766   :  { %4802 = shalt.err (!%p4799_p5)
}
0x1767   :  { %s5668_s4 = smov 128  }
0x1768   :  { %3961 = dma.vmem_to_hbm [thread:$0]  %s3956_s22, 256, %s5667_s21, [#allocation5], %s5668_s4, %s5668_s4, %s5665_s16  }
0x1769   :  { %4809 = dma.done.wait [#allocation5], 256  }
0x176a   :  { %4810 = vsyncadd [#allocation5], 4294967040 }
0x176b   :  { %3965 = vsyncpa [#allocation4], 1 }
0x176c   :  { %3966 = vsyncpa [#allocation7], 1 }
0x176d   :  { %3967 = vsyncpa [#allocation10], 1 }
0x176e   :  { %3968 = vsyncpa [#allocation5], 1 }

</bundles_post_ra>
